<compile_context>
chip_gen: v7x
topology: tpu7x:2x2x1
jax: 0.10.0
libtpu: 0.0.40
codegen_flags: <defaults>
</compile_context>

<pallas_src>
import functools

import jax
import jax.numpy as jnp
from jax.experimental import pallas as pl
from jax.experimental.pallas import tpu as pltpu

COMPUTE_DTYPE = jnp.bfloat16  # HBM storage / MXU input dtype for features


def _pad_info(n):
    """(padded point count, N-tile size). N>=256 -> 256-tiles, else one tile."""
    if n >= 256:
        tn = 256
        n_pad = ((n + tn - 1) // tn) * tn
    else:
        n_pad = ((n + 7) // 8) * 8
        tn = n_pad
    return n_pad, tn


# ----------------------------------------------------------------------------
# Kernel 1: fused pairwise-distance + running top-k  (k-NN graph, f32)
# ----------------------------------------------------------------------------
def _knn_kernel(xq_ref, xat_ref, idx_ref, *, k, n_pad, n_real):
    xq = xq_ref[0]            # (TQ, D)   query points (rows)
    xat = xat_ref[0]          # (D, N_pad) all points, transposed (lane-dense)
    tq, d_dim = xq.shape

    # Squared distances via VPU broadcasts (D is tiny; skip MXU / norm math).
    d = jnp.zeros((tq, n_pad), jnp.float32)
    for c in range(d_dim):                       # static, D == 3
        diff = xq[:, c:c + 1] - xat[c:c + 1, :]  # (TQ,1)-(1,N) -> (TQ,N)
        d = d + diff * diff

    col = jax.lax.broadcasted_iota(jnp.int32, (tq, n_pad), 1)
    if n_real < n_pad:                           # static: mask padded points
        d = jnp.where(col < n_real, d, jnp.inf)

    # Running top-k (smallest distance first, ties broken by lowest index,
    # matching lax.top_k(-d) / the original dgl-style graph incl. self-loop).
    colk = jax.lax.broadcasted_iota(jnp.int32, (tq, k), 1)
    out = jnp.zeros((tq, k), jnp.int32)
    for j in range(k):                           # static, small k
        dmin = jnp.min(d, axis=-1, keepdims=True)
        imin = jnp.min(jnp.where(d <= dmin, col, n_pad), axis=-1,
                       keepdims=True)            # (TQ, 1) int32
        out = jnp.where(colk == j, imin, out)
        d = jnp.where(col == imin, jnp.inf, d)
    idx_ref[0] = out


def knn_indices(xyz, k, n_real, tn):
    B, n_pad, D = xyz.shape
    # Cap the query tile for large N (bounds O(TQ*N) temporaries; v5e VMEM).
    tq = min(tn, 128 if n_pad >= 4096 else 256)
    xyz = xyz.astype(jnp.float32)
    xyz_t = jnp.swapaxes(xyz, 1, 2)              # (B, D, N_pad)
    return pl.pallas_call(
        functools.partial(_knn_kernel, k=k, n_pad=n_pad, n_real=n_real),
        out_shape=jax.ShapeDtypeStruct((B, n_pad, k), jnp.int32),
        grid=(B, n_pad // tq),
        in_specs=[
            pl.BlockSpec((1, tq, D), lambda b, q: (b, q, 0)),
            pl.BlockSpec((1, D, n_pad), lambda b, q: (b, 0, 0)),
        ],
        out_specs=pl.BlockSpec((1, tq, k), lambda b, q: (b, q, 0)),
        compiler_params=pltpu.CompilerParams(
            dimension_semantics=("parallel", "parallel")),
    )(xyz, xyz_t)


# ----------------------------------------------------------------------------
# Shared in-kernel EdgeConv tile: t gather/max + h@(phi-theta) + BN + lrelu
# ----------------------------------------------------------------------------
def _edge_tile(h_ref, idx_ref, pmt_ref, g_ref, b_ref, t_ref, n, *, tn, k, n_pad):
    start = pl.multiple_of(n * tn, 8)
    h_tile = h_ref[0, pl.ds(start, tn), :]                         # (tn, Fin)
    u = jnp.dot(h_tile, pmt_ref[...],
                preferred_element_type=jnp.float32)                # (tn, Fout)

    # In-VMEM neighbour gather + running max: one-hot rows on the MXU.
    # Exact: one-hot entries are 0/1, so 1.0 * t accumulates exactly in f32.
    idx = idx_ref[0]                                               # (tn, K)
    col = jax.lax.broadcasted_iota(jnp.int32, (tn, n_pad), 1)
    t = t_ref[...]                                                 # (N_pad, Fout)
    m = None
    for j in range(k):                                             # static K
        onehot = (col == idx[:, j:j + 1]).astype(t.dtype)          # (tn, N_pad)
        rows = jnp.dot(onehot, t, preferred_element_type=jnp.float32)
        m = rows if m is None else jnp.maximum(m, rows)

    y = (m + u) * g_ref[...] + b_ref[...]                          # BN1d (eval)
    return jnp.where(y >= 0, y, 0.2 * y)                           # leaky_relu


# ----------------------------------------------------------------------------
# Kernel 2: fused EdgeConv layer (theta transform + gather + aggregate)
# ----------------------------------------------------------------------------
def _edgeconv_kernel(h_ref, idx_ref, th_ref, pmt_ref, g_ref, b_ref,
                     o_ref, t_ref, *, tn, k, n_pad):
    n = pl.program_id(1)

    # t = h @ theta for the whole point set, once per batch (VMEM-resident).
    @pl.when(n == 0)
    def _():
        t_ref[...] = jnp.dot(h_ref[0], th_ref[...],
                             preferred_element_type=jnp.float32
                             ).astype(t_ref.dtype)

    y = _edge_tile(h_ref, idx_ref, pmt_ref, g_ref, b_ref, t_ref, n,
                   tn=tn, k=k, n_pad=n_pad)
    o_ref[0] = y.astype(o_ref.dtype)


def edgeconv_layer(h, idx, theta, pmt, g_eff, b_eff, tn):
    B, n_pad, Fin = h.shape
    K = idx.shape[-1]
    Fout = theta.shape[1]
    return pl.pallas_call(
        functools.partial(_edgeconv_kernel, tn=tn, k=K, n_pad=n_pad),
        out_shape=jax.ShapeDtypeStruct((B, n_pad, Fout), h.dtype),
        grid=(B, n_pad // tn),
        in_specs=[
            pl.BlockSpec((1, n_pad, Fin), lambda b, n: (b, 0, 0)),
            pl.BlockSpec((1, tn, K), lambda b, n: (b, n, 0)),
            pl.BlockSpec((Fin, Fout), lambda b, n: (0, 0)),
            pl.BlockSpec((Fin, Fout), lambda b, n: (0, 0)),
            pl.BlockSpec((1, Fout), lambda b, n: (0, 0)),
            pl.BlockSpec((1, Fout), lambda b, n: (0, 0)),
        ],
        out_specs=pl.BlockSpec((1, tn, Fout), lambda b, n: (b, n, 0)),
        scratch_shapes=[pltpu.VMEM((n_pad, Fout), COMPUTE_DTYPE)],
        compiler_params=pltpu.CompilerParams(
            # N axis is "arbitrary": the full-N t scratch + pooling-style
            # init at n==0 require sequential n per batch (b stays parallel).
            dimension_semantics=("parallel", "arbitrary")),
    )(h, idx, theta, pmt, g_eff, b_eff)


# ----------------------------------------------------------------------------
# Kernel 3: LAST EdgeConv layer fused with max/mean pooling + dense head
# ----------------------------------------------------------------------------
def _edgeconv_head_kernel(h_ref, idx_ref, th_ref, pmt_ref, g_ref, b_ref,
                          w1_ref, w2_ref, ge_ref, be_ref, wp_ref, bp_ref,
                          o_ref, t_ref, hmax_ref, hsum_ref,
                          *, tn, k, n_pad, n_real):
    n = pl.program_id(1)

    @pl.when(n == 0)
    def _():
        t_ref[...] = jnp.dot(h_ref[0], th_ref[...],
                             preferred_element_type=jnp.float32
                             ).astype(t_ref.dtype)
        hmax_ref[...] = jnp.full_like(hmax_ref, -jnp.inf)
        hsum_ref[...] = jnp.zeros_like(hsum_ref)

    y = _edge_tile(h_ref, idx_ref, pmt_ref, g_ref, b_ref, t_ref, n,
                   tn=tn, k=k, n_pad=n_pad)                        # (tn, Fout)

    if n_real < n_pad:                       # static: exclude padded rows
        rows_g = jax.lax.broadcasted_iota(jnp.int32, (tn, 1), 0) + n * tn
        valid = rows_g < n_real
        y_max = jnp.where(valid, y, -jnp.inf)
        y_sum = jnp.where(valid, y, 0.0)
    else:
        y_max, y_sum = y, y

    hmax_ref[...] = jnp.maximum(hmax_ref[...],
                                jnp.max(y_max, axis=0, keepdims=True))
    hsum_ref[...] = hsum_ref[...] + jnp.sum(y_sum, axis=0, keepdims=True)

    # Final grid step: emb Linear (no bias) -> BN(eval) -> Dropout(eval)=id
    # -> proj Linear (+bias), written straight into the (1, C) logits block.
    @pl.when(n == pl.num_programs(1) - 1)
    def _():
        hmax = hmax_ref[...]
        havg = hsum_ref[...] * (1.0 / n_real)
        e = (jnp.dot(hmax, w1_ref[...], preferred_element_type=jnp.float32)
             + jnp.dot(havg, w2_ref[...], preferred_element_type=jnp.float32))
        e = e * ge_ref[...] + be_ref[...]
        o_ref[0] = (jnp.dot(e, wp_ref[...], preferred_element_type=jnp.float32)
                    + bp_ref[...]).astype(o_ref.dtype)


def edgeconv_pool_head(h, idx, theta, pmt, g_eff, b_eff,
                       w_emb_max, w_emb_avg, g_emb, b_emb, wproj, bproj,
                       tn, n_real):
    B, n_pad, Fin = h.shape
    K = idx.shape[-1]
    Fout = theta.shape[1]
    E = w_emb_max.shape[1]
    C = wproj.shape[1]
    logits = pl.pallas_call(
        functools.partial(_edgeconv_head_kernel, tn=tn, k=K,
                          n_pad=n_pad, n_real=n_real),
        out_shape=jax.ShapeDtypeStruct((B, 1, C), jnp.float32),
        grid=(B, n_pad // tn),
        in_specs=[
            pl.BlockSpec((1, n_pad, Fin), lambda b, n: (b, 0, 0)),
            pl.BlockSpec((1, tn, K), lambda b, n: (b, n, 0)),
            pl.BlockSpec((Fin, Fout), lambda b, n: (0, 0)),
            pl.BlockSpec((Fin, Fout), lambda b, n: (0, 0)),
            pl.BlockSpec((1, Fout), lambda b, n: (0, 0)),
            pl.BlockSpec((1, Fout), lambda b, n: (0, 0)),
            pl.BlockSpec((Fout, E), lambda b, n: (0, 0)),
            pl.BlockSpec((Fout, E), lambda b, n: (0, 0)),
            pl.BlockSpec((1, E), lambda b, n: (0, 0)),
            pl.BlockSpec((1, E), lambda b, n: (0, 0)),
            pl.BlockSpec((E, C), lambda b, n: (0, 0)),
            pl.BlockSpec((1, C), lambda b, n: (0, 0)),
        ],
        out_specs=pl.BlockSpec((1, 1, C), lambda b, n: (b, 0, 0)),
        scratch_shapes=[pltpu.VMEM((n_pad, Fout), COMPUTE_DTYPE),
                        pltpu.VMEM((1, Fout), jnp.float32),
                        pltpu.VMEM((1, Fout), jnp.float32)],
        compiler_params=pltpu.CompilerParams(
            dimension_semantics=("parallel", "arbitrary")),
    )(h, idx, theta, pmt, g_eff, b_eff,
      w_emb_max, w_emb_avg, g_emb, b_emb, wproj, bproj)
    return logits.reshape(B, C)


# ----------------------------------------------------------------------------
# Parameter init (deterministic, kaiming-ish) and full forward
# ----------------------------------------------------------------------------
def _bn_eval_params(num_features, eps=1e-5):
    gamma = jnp.ones((1, num_features), jnp.float32)
    beta = jnp.zeros((1, num_features), jnp.float32)
    mean = jnp.zeros((1, num_features), jnp.float32)
    var = jnp.ones((1, num_features), jnp.float32)
    g_eff = gamma / jnp.sqrt(var + eps)
    b_eff = beta - mean * g_eff
    return g_eff, b_eff


def init_params(key, input_dims, feature_dims, emb_dim, num_classes):
    params = {}
    keys = jax.random.split(key, 16)
    ki = iter(range(16))
    fin = input_dims
    for i, fout in enumerate(feature_dims):
        std = (2.0 / fin) ** 0.5
        theta = std * jax.random.normal(keys[next(ki)], (fin, fout), jnp.float32)
        phi = std * jax.random.normal(keys[next(ki)], (fin, fout), jnp.float32)
        params[f"theta{i}"] = theta
        params[f"pmt{i}"] = phi - theta          # phi - theta (precomputed)
        params[f"g{i}"], params[f"b{i}"] = _bn_eval_params(fout)
        fin = fout
    f_last = feature_dims[-1]
    std = (2.0 / (2 * f_last)) ** 0.5
    wemb = std * jax.random.normal(keys[next(ki)], (2 * f_last, emb_dim), jnp.float32)
    params["w_emb_max"] = wemb[:f_last, :]       # pre-split (no in-kernel slice)
    params["w_emb_avg"] = wemb[f_last:, :]
    params["g_emb"], params["b_emb"] = _bn_eval_params(emb_dim)
    params["wproj"] = 0.001 * jax.random.normal(keys[next(ki)], (emb_dim, num_classes), jnp.float32)
    params["bproj"] = jnp.zeros((1, num_classes), jnp.float32)
    return params


@functools.partial(jax.jit, static_argnames=("k", "num_layers"))
def model_forward(xyz, rgb, params, k, num_layers):
    B, N, _ = xyz.shape
    assert k <= N, "k-NN requires k <= number of points"
    n_pad, tn = _pad_info(N)
    if n_pad != N:
        pad = ((0, 0), (0, n_pad - N), (0, 0))
        xyz = jnp.pad(xyz, pad)   # padded candidates masked inside k-NN kernel
        rgb = jnp.pad(rgb, pad)   # padded rows excluded from pooling

    # cluster='xyz' and the SA module is identity, so the k-NN graph is
    # identical for every layer -> compute it ONCE (hoisted out of the loop).
    idx = knn_indices(xyz, k, n_real=N, tn=tn)

    h = rgb.astype(COMPUTE_DTYPE)
    for i in range(num_layers - 1):
        h = edgeconv_layer(
            h, idx,
            params[f"theta{i}"].astype(COMPUTE_DTYPE),
            params[f"pmt{i}"].astype(COMPUTE_DTYPE),
            params[f"g{i}"], params[f"b{i}"], tn=tn)
        # TODO(synk): PointnetSAModule (FPS + ball-query + shared MLP, use_se)
        # has no provided source; treated as identity (no downsampling).

    i = num_layers - 1
    return edgeconv_pool_head(
        h, idx,
        params[f"theta{i}"].astype(COMPUTE_DTYPE),
        params[f"pmt{i}"].astype(COMPUTE_DTYPE),
        params[f"g{i}"], params[f"b{i}"],
        params["w_emb_max"], params["w_emb_avg"],
        params["g_emb"], params["b_emb"],
        params["wproj"], params["bproj"],
        tn=tn, n_real=N)


def reference_forward(xyz, rgb, params, k, num_layers):
    """Pure-JAX f32 reference (same algebraic EdgeConv rewrite)."""
    d = jnp.sum((xyz[:, :, None, :] - xyz[:, None, :, :]) ** 2, axis=-1)
    _, idx = jax.lax.top_k(-d, k)                              # (B, N, k)
    h = rgb
    for i in range(num_layers):
        t = h @ params[f"theta{i}"]
        t_nbr = jax.vmap(lambda tb, ib: tb[ib])(t, idx)        # (B, N, k, F)
        m = jnp.max(t_nbr, axis=2)
        u = h @ params[f"pmt{i}"]
        y = (m + u) * params[f"g{i}"] + params[f"b{i}"]
        h = jnp.where(y >= 0, y, 0.2 * y)
    hmax = jnp.max(h, axis=1)
    havg = jnp.mean(h, axis=1)
    e = hmax @ params["w_emb_max"] + havg @ params["w_emb_avg"]
    e = e * params["g_emb"] + params["b_emb"]
    return e @ params["wproj"] + params["bproj"]


if __name__ == "__main__":
    B, N, K = 2, 20, 4           # N=20 -> padded to 24 (exercises mask paths)
    input_dims = 3
    feature_dims = [32, 32]
    emb_dim = 64
    num_classes = 10

    key = jax.random.PRNGKey(0)
    kx, kr, kp = jax.random.split(key, 3)
    xyz = jax.random.normal(kx, (B, N, input_dims), jnp.float32)
    rgb = jax.random.normal(kr, (B, N, input_dims), jnp.float32)
    params = init_params(kp, input_dims, feature_dims, emb_dim, num_classes)

    out = model_forward(xyz, rgb, params, k=K, num_layers=len(feature_dims))
    out = jax.block_until_ready(out)
    assert out.shape == (B, num_classes), out.shape
    assert bool(jnp.all(jnp.isfinite(out)))

    ref = reference_forward(xyz, rgb, params, K, len(feature_dims))
    err = float(jnp.max(jnp.abs(out - ref)))
    assert err < 3e-2, f"mismatch vs f32 reference: {err}"
    print("KERNEL_OK")
</pallas_src>

<mosaic_0001>
module attributes {stable_mosaic.version = 11 : i64} {
  func.func @_knn_kernel(%arg0: i32, %arg1: i32, %arg2: memref<1x24x3xf32, #tpu.memory_space<vmem>>, %arg3: memref<1x3x24xf32, #tpu.memory_space<vmem>>, %arg4: memref<1x24x4xi32, #tpu.memory_space<vmem>>) attributes {dimension_semantics = [#tpu.dimension_semantics<parallel>, #tpu.dimension_semantics<parallel>], iteration_bounds = array<i64: 2, 1>, scalar_prefetch = 0 : i64, scratch_operands = 0 : i64, tpu.core_type = #tpu.core_type<tc>, window_params = [{transform_indices = @transform_0, window_bounds = array<i64: 1, 24, 3>}, {transform_indices = @transform_1, window_bounds = array<i64: 1, 3, 24>}, {transform_indices = @transform_2, window_bounds = array<i64: 1, 24, 4>}]} {
    %c0 = arith.constant 0 : index
    %c0_0 = arith.constant 0 : index
    %c0_1 = arith.constant 0 : index
    %0 = vector.load %arg2[%c0, %c0_0, %c0_1] : memref<1x24x3xf32, #tpu.memory_space<vmem>>, vector<1x24x3xf32>
    %1 = vector.shape_cast %0 : vector<1x24x3xf32> to vector<24x3xf32>
    %c0_2 = arith.constant 0 : index
    %c0_3 = arith.constant 0 : index
    %c0_4 = arith.constant 0 : index
    %2 = vector.load %arg3[%c0_2, %c0_3, %c0_4] : memref<1x3x24xf32, #tpu.memory_space<vmem>>, vector<1x3x24xf32>
    %3 = vector.shape_cast %2 : vector<1x3x24xf32> to vector<3x24xf32>
    %cst = arith.constant 0.000000e+00 : f32
    %4 = vector.broadcast %cst : f32 to vector<24x24xf32>
    %5 = vector.extract_strided_slice %1 {offsets = [0, 0], sizes = [24, 1], strides = [1, 1]} : vector<24x3xf32> to vector<24x1xf32>
    %6 = vector.extract_strided_slice %3 {offsets = [0, 0], sizes = [1, 24], strides = [1, 1]} : vector<3x24xf32> to vector<1x24xf32>
    %7 = vector.broadcast %5 : vector<24x1xf32> to vector<24x24xf32>
    %8 = vector.broadcast %6 : vector<1x24xf32> to vector<24x24xf32>
    %9 = arith.subf %7, %8 : vector<24x24xf32>
    %10 = arith.mulf %9, %9 : vector<24x24xf32>
    %11 = arith.addf %4, %10 : vector<24x24xf32>
    %12 = vector.extract_strided_slice %1 {offsets = [0, 1], sizes = [24, 1], strides = [1, 1]} : vector<24x3xf32> to vector<24x1xf32>
    %13 = vector.extract_strided_slice %3 {offsets = [1, 0], sizes = [1, 24], strides = [1, 1]} : vector<3x24xf32> to vector<1x24xf32>
    %14 = vector.broadcast %12 : vector<24x1xf32> to vector<24x24xf32>
    %15 = vector.broadcast %13 : vector<1x24xf32> to vector<24x24xf32>
    %16 = arith.subf %14, %15 : vector<24x24xf32>
    %17 = arith.mulf %16, %16 : vector<24x24xf32>
    %18 = arith.addf %11, %17 : vector<24x24xf32>
    %19 = vector.extract_strided_slice %1 {offsets = [0, 2], sizes = [24, 1], strides = [1, 1]} : vector<24x3xf32> to vector<24x1xf32>
    %20 = vector.extract_strided_slice %3 {offsets = [2, 0], sizes = [1, 24], strides = [1, 1]} : vector<3x24xf32> to vector<1x24xf32>
    %21 = vector.broadcast %19 : vector<24x1xf32> to vector<24x24xf32>
    %22 = vector.broadcast %20 : vector<1x24xf32> to vector<24x24xf32>
    %23 = arith.subf %21, %22 : vector<24x24xf32>
    %24 = arith.mulf %23, %23 : vector<24x24xf32>
    %25 = arith.addf %18, %24 : vector<24x24xf32>
    %26 = tpu.iota {dimensions = array<i32: 1>} : vector<24x24xi32>
    %c20_i32 = arith.constant 20 : i32
    %27 = vector.broadcast %c20_i32 : i32 to vector<24x24xi32>
    %28 = arith.cmpi slt, %26, %27 : vector<24x24xi32>
    %cst_5 = arith.constant 0x7F800000 : f32
    %29 = vector.broadcast %cst_5 : f32 to vector<24x24xf32>
    %30 = arith.select %28, %25, %29 : vector<24x24xi1>, vector<24x24xf32>
    %31 = tpu.iota {dimensions = array<i32: 1>} : vector<24x4xi32>
    %c0_i32 = arith.constant 0 : i32
    %32 = vector.broadcast %c0_i32 : i32 to vector<24x4xi32>
    %cst_6 = arith.constant dense<0x7F800000> : vector<24xf32>
    %33 = vector.multi_reduction <minimumf>, %30, %cst_6 [1] : vector<24x24xf32> to vector<24xf32>
    %34 = vector.shape_cast %33 : vector<24xf32> to vector<24x1xf32>
    %35 = vector.broadcast %34 : vector<24x1xf32> to vector<24x24xf32>
    %36 = arith.cmpf ole, %30, %35 : vector<24x24xf32>
    %c24_i32 = arith.constant 24 : i32
    %37 = vector.broadcast %c24_i32 : i32 to vector<24x24xi32>
    %38 = arith.select %36, %26, %37 : vector<24x24xi1>, vector<24x24xi32>
    %cst_7 = arith.constant dense<2147483647> : vector<24xi32>
    %39 = vector.multi_reduction <minsi>, %38, %cst_7 [1] : vector<24x24xi32> to vector<24xi32>
    %40 = vector.shape_cast %39 : vector<24xi32> to vector<24x1xi32>
    %c0_i32_8 = arith.constant 0 : i32
    %41 = vector.broadcast %c0_i32_8 : i32 to vector<24x4xi32>
    %42 = arith.cmpi eq, %31, %41 : vector<24x4xi32>
    %43 = vector.shape_cast %40 : vector<24x1xi32> to vector<24x1xi32>
    %44 = vector.broadcast %43 : vector<24x1xi32> to vector<24x4xi32>
    %45 = arith.select %42, %44, %32 : vector<24x4xi1>, vector<24x4xi32>
    %46 = vector.broadcast %40 : vector<24x1xi32> to vector<24x24xi32>
    %47 = arith.cmpi eq, %26, %46 : vector<24x24xi32>
    %cst_9 = arith.constant 0x7F800000 : f32
    %48 = vector.broadcast %cst_9 : f32 to vector<24x24xf32>
    %49 = arith.select %47, %48, %30 : vector<24x24xi1>, vector<24x24xf32>
    %cst_10 = arith.constant dense<0x7F800000> : vector<24xf32>
    %50 = vector.multi_reduction <minimumf>, %49, %cst_10 [1] : vector<24x24xf32> to vector<24xf32>
    %51 = vector.shape_cast %50 : vector<24xf32> to vector<24x1xf32>
    %52 = vector.broadcast %51 : vector<24x1xf32> to vector<24x24xf32>
    %53 = arith.cmpf ole, %49, %52 : vector<24x24xf32>
    %c24_i32_11 = arith.constant 24 : i32
    %54 = vector.broadcast %c24_i32_11 : i32 to vector<24x24xi32>
    %55 = arith.select %53, %26, %54 : vector<24x24xi1>, vector<24x24xi32>
    %cst_12 = arith.constant dense<2147483647> : vector<24xi32>
    %56 = vector.multi_reduction <minsi>, %55, %cst_12 [1] : vector<24x24xi32> to vector<24xi32>
    %57 = vector.shape_cast %56 : vector<24xi32> to vector<24x1xi32>
    %c1_i32 = arith.constant 1 : i32
    %58 = vector.broadcast %c1_i32 : i32 to vector<24x4xi32>
    %59 = arith.cmpi eq, %31, %58 : vector<24x4xi32>
    %60 = vector.shape_cast %57 : vector<24x1xi32> to vector<24x1xi32>
    %61 = vector.broadcast %60 : vector<24x1xi32> to vector<24x4xi32>
    %62 = arith.select %59, %61, %45 : vector<24x4xi1>, vector<24x4xi32>
    %63 = vector.broadcast %57 : vector<24x1xi32> to vector<24x24xi32>
    %64 = arith.cmpi eq, %26, %63 : vector<24x24xi32>
    %cst_13 = arith.constant 0x7F800000 : f32
    %65 = vector.broadcast %cst_13 : f32 to vector<24x24xf32>
    %66 = arith.select %64, %65, %49 : vector<24x24xi1>, vector<24x24xf32>
    %cst_14 = arith.constant dense<0x7F800000> : vector<24xf32>
    %67 = vector.multi_reduction <minimumf>, %66, %cst_14 [1] : vector<24x24xf32> to vector<24xf32>
    %68 = vector.shape_cast %67 : vector<24xf32> to vector<24x1xf32>
    %69 = vector.broadcast %68 : vector<24x1xf32> to vector<24x24xf32>
    %70 = arith.cmpf ole, %66, %69 : vector<24x24xf32>
    %c24_i32_15 = arith.constant 24 : i32
    %71 = vector.broadcast %c24_i32_15 : i32 to vector<24x24xi32>
    %72 = arith.select %70, %26, %71 : vector<24x24xi1>, vector<24x24xi32>
    %cst_16 = arith.constant dense<2147483647> : vector<24xi32>
    %73 = vector.multi_reduction <minsi>, %72, %cst_16 [1] : vector<24x24xi32> to vector<24xi32>
    %74 = vector.shape_cast %73 : vector<24xi32> to vector<24x1xi32>
    %c2_i32 = arith.constant 2 : i32
    %75 = vector.broadcast %c2_i32 : i32 to vector<24x4xi32>
    %76 = arith.cmpi eq, %31, %75 : vector<24x4xi32>
    %77 = vector.shape_cast %74 : vector<24x1xi32> to vector<24x1xi32>
    %78 = vector.broadcast %77 : vector<24x1xi32> to vector<24x4xi32>
    %79 = arith.select %76, %78, %62 : vector<24x4xi1>, vector<24x4xi32>
    %80 = vector.broadcast %74 : vector<24x1xi32> to vector<24x24xi32>
    %81 = arith.cmpi eq, %26, %80 : vector<24x24xi32>
    %cst_17 = arith.constant 0x7F800000 : f32
    %82 = vector.broadcast %cst_17 : f32 to vector<24x24xf32>
    %83 = arith.select %81, %82, %66 : vector<24x24xi1>, vector<24x24xf32>
    %cst_18 = arith.constant dense<0x7F800000> : vector<24xf32>
    %84 = vector.multi_reduction <minimumf>, %83, %cst_18 [1] : vector<24x24xf32> to vector<24xf32>
    %85 = vector.shape_cast %84 : vector<24xf32> to vector<24x1xf32>
    %86 = vector.broadcast %85 : vector<24x1xf32> to vector<24x24xf32>
    %87 = arith.cmpf ole, %83, %86 : vector<24x24xf32>
    %c24_i32_19 = arith.constant 24 : i32
    %88 = vector.broadcast %c24_i32_19 : i32 to vector<24x24xi32>
    %89 = arith.select %87, %26, %88 : vector<24x24xi1>, vector<24x24xi32>
    %cst_20 = arith.constant dense<2147483647> : vector<24xi32>
    %90 = vector.multi_reduction <minsi>, %89, %cst_20 [1] : vector<24x24xi32> to vector<24xi32>
    %91 = vector.shape_cast %90 : vector<24xi32> to vector<24x1xi32>
    %c3_i32 = arith.constant 3 : i32
    %92 = vector.broadcast %c3_i32 : i32 to vector<24x4xi32>
    %93 = arith.cmpi eq, %31, %92 : vector<24x4xi32>
    %94 = vector.shape_cast %91 : vector<24x1xi32> to vector<24x1xi32>
    %95 = vector.broadcast %94 : vector<24x1xi32> to vector<24x4xi32>
    %96 = arith.select %93, %95, %79 : vector<24x4xi1>, vector<24x4xi32>
    %c0_21 = arith.constant 0 : index
    %c0_22 = arith.constant 0 : index
    %c0_23 = arith.constant 0 : index
    %97 = vector.load %arg4[%c0_21, %c0_22, %c0_23] : memref<1x24x4xi32, #tpu.memory_space<vmem>>, vector<1x24x4xi32>
    %98 = vector.shape_cast %97 : vector<1x24x4xi32> to vector<24x4xi32>
    %99 = vector.shape_cast %96 : vector<24x4xi32> to vector<1x24x4xi32>
    tpu.vector_store %arg4[%c0_21, %c0_22, %c0_23], %99 {strides = array<i32>} : memref<1x24x4xi32, #tpu.memory_space<vmem>>, vector<1x24x4xi32>,
    return
  }
  func.func @transform_0(%arg0: i32, %arg1: i32) -> (i32, i32, i32) {
    %c0_i32 = arith.constant 0 : i32
    %c0_i32_0 = arith.constant 0 : i32
    return %arg0, %arg1, %c0_i32 : i32, i32, i32
  }
  func.func @transform_1(%arg0: i32, %arg1: i32) -> (i32, i32, i32) {
    %c0_i32 = arith.constant 0 : i32
    %c0_i32_0 = arith.constant 0 : i32
    %c0_i32_1 = arith.constant 0 : i32
    return %arg0, %c0_i32, %c0_i32_0 : i32, i32, i32
  }
  func.func @transform_2(%arg0: i32, %arg1: i32) -> (i32, i32, i32) {
    %c0_i32 = arith.constant 0 : i32
    %c0_i32_0 = arith.constant 0 : i32
    return %arg0, %arg1, %c0_i32 : i32, i32, i32
  }
}

module attributes {stable_mosaic.version = 11 : i64} {
  func.func @_edgeconv_kernel(%arg0: i32, %arg1: i32, %arg2: memref<1x24x3xbf16, #tpu.memory_space<vmem>>, %arg3: memref<1x24x4xi32, #tpu.memory_space<vmem>>, %arg4: memref<3x32xbf16, #tpu.memory_space<vmem>>, %arg5: memref<3x32xbf16, #tpu.memory_space<vmem>>, %arg6: memref<1x32xf32, #tpu.memory_space<vmem>>, %arg7: memref<1x32xf32, #tpu.memory_space<vmem>>, %arg8: memref<1x24x32xbf16, #tpu.memory_space<vmem>>, %arg9: memref<24x32xbf16, #tpu.memory_space<vmem>>) attributes {dimension_semantics = [#tpu.dimension_semantics<parallel>, #tpu.dimension_semantics<arbitrary>], iteration_bounds = array<i64: 2, 1>, scalar_prefetch = 0 : i64, scratch_operands = 1 : i64, tpu.core_type = #tpu.core_type<tc>, window_params = [{transform_indices = @transform_0, window_bounds = array<i64: 1, 24, 3>}, {transform_indices = @transform_1, window_bounds = array<i64: 1, 24, 4>}, {pipeline_mode = #tpu.pipeline_mode<synchronous>, transform_indices = @transform_2, window_bounds = array<i64: 3, 32>}, {pipeline_mode = #tpu.pipeline_mode<synchronous>, transform_indices = @transform_3, window_bounds = array<i64: 3, 32>}, {pipeline_mode = #tpu.pipeline_mode<synchronous>, transform_indices = @transform_4, window_bounds = array<i64: 1, 32>}, {pipeline_mode = #tpu.pipeline_mode<synchronous>, transform_indices = @transform_5, window_bounds = array<i64: 1, 32>}, {transform_indices = @transform_6, window_bounds = array<i64: 1, 24, 32>}]} {
    %c0_i32 = arith.constant 0 : i32
    %0 = arith.cmpi eq, %arg1, %c0_i32 : i32
    %1 = arith.extui %0 : i1 to i32
    %c0_i32_0 = arith.constant 0 : i32
    %2 = arith.cmpi ne, %1, %c0_i32_0 : i32
    scf.if %2 {
      %c0_22 = arith.constant 0 : index
      %c0_23 = arith.constant 0 : index
      %c0_24 = arith.constant 0 : index
      %61 = vector.load %arg2[%c0_22, %c0_23, %c0_24] : memref<1x24x3xbf16, #tpu.memory_space<vmem>>, vector<1x24x3xbf16>
      %62 = vector.shape_cast %61 : vector<1x24x3xbf16> to vector<24x3xbf16>
      %c0_25 = arith.constant 0 : index
      %c0_26 = arith.constant 0 : index
      %63 = vector.load %arg4[%c0_25, %c0_26] : memref<3x32xbf16, #tpu.memory_space<vmem>>, vector<3x32xbf16>
      %cst_27 = arith.constant dense<0.000000e+00> : vector<24x32xf32>
      %64 = tpu.matmul %62, %63, %cst_27 {dimension_numbers = #tpu.dot_dimension_numbers<[1], [0], [0], [1], [0, 0, 1, 1], [], []>} : vector<24x3xbf16>, vector<3x32xbf16>, vector<24x32xf32> -> vector<24x32xf32>
      %65 = arith.truncf %64 : vector<24x32xf32> to vector<24x32xbf16>
      %c0_28 = arith.constant 0 : index
      %c0_29 = arith.constant 0 : index
      %66 = vector.load %arg9[%c0_28, %c0_29] : memref<24x32xbf16, #tpu.memory_space<vmem>>, vector<24x32xbf16>
      tpu.vector_store %arg9[%c0_28, %c0_29], %65 {strides = array<i32>} : memref<24x32xbf16, #tpu.memory_space<vmem>>, vector<24x32xbf16>,
    } else {
    }
    %c24_i32 = arith.constant 24 : i32
    %3 = arith.muli %arg1, %c24_i32 : i32
    %4 = tpu.assume_multiple %3, 8 : i32
    %c0 = arith.constant 0 : index
    %5 = arith.index_cast %4 : i32 to index
    %c0_1 = arith.constant 0 : index
    %6 = vector.load %arg2[%c0, %5, %c0_1] : memref<1x24x3xbf16, #tpu.memory_space<vmem>>, vector<1x24x3xbf16>
    %7 = vector.shape_cast %6 : vector<1x24x3xbf16> to vector<24x3xbf16>
    %c0_2 = arith.constant 0 : index
    %c0_3 = arith.constant 0 : index
    %8 = vector.load %arg5[%c0_2, %c0_3] : memref<3x32xbf16, #tpu.memory_space<vmem>>, vector<3x32xbf16>
    %cst = arith.constant dense<0.000000e+00> : vector<24x32xf32>
    %9 = tpu.matmul %7, %8, %cst {dimension_numbers = #tpu.dot_dimension_numbers<[1], [0], [0], [1], [0, 0, 1, 1], [], []>} : vector<24x3xbf16>, vector<3x32xbf16>, vector<24x32xf32> -> vector<24x32xf32>
    %c0_4 = arith.constant 0 : index
    %c0_5 = arith.constant 0 : index
    %c0_6 = arith.constant 0 : index
    %10 = vector.load %arg3[%c0_4, %c0_5, %c0_6] : memref<1x24x4xi32, #tpu.memory_space<vmem>>, vector<1x24x4xi32>
    %11 = vector.shape_cast %10 : vector<1x24x4xi32> to vector<24x4xi32>
    %12 = tpu.iota {dimensions = array<i32: 1>} : vector<24x24xi32>
    %c0_7 = arith.constant 0 : index
    %c0_8 = arith.constant 0 : index
    %13 = vector.load %arg9[%c0_7, %c0_8] : memref<24x32xbf16, #tpu.memory_space<vmem>>, vector<24x32xbf16>
    %14 = vector.extract_strided_slice %11 {offsets = [0, 0], sizes = [24, 1], strides = [1, 1]} : vector<24x4xi32> to vector<24x1xi32>
    %15 = vector.broadcast %14 : vector<24x1xi32> to vector<24x24xi32>
    %16 = arith.cmpi eq, %12, %15 : vector<24x24xi32>
    %17 = arith.extui %16 : vector<24x24xi1> to vector<24x24xi32>
    %18 = arith.sitofp %17 : vector<24x24xi32> to vector<24x24xf32>
    %19 = arith.truncf %18 : vector<24x24xf32> to vector<24x24xbf16>
    %cst_9 = arith.constant dense<0.000000e+00> : vector<24x32xf32>
    %20 = tpu.matmul %19, %13, %cst_9 {dimension_numbers = #tpu.dot_dimension_numbers<[1], [0], [0], [1], [0, 0, 1, 1], [], []>} : vector<24x24xbf16>, vector<24x32xbf16>, vector<24x32xf32> -> vector<24x32xf32>
    %21 = vector.extract_strided_slice %11 {offsets = [0, 1], sizes = [24, 1], strides = [1, 1]} : vector<24x4xi32> to vector<24x1xi32>
    %22 = vector.broadcast %21 : vector<24x1xi32> to vector<24x24xi32>
    %23 = arith.cmpi eq, %12, %22 : vector<24x24xi32>
    %24 = arith.extui %23 : vector<24x24xi1> to vector<24x24xi32>
    %25 = arith.sitofp %24 : vector<24x24xi32> to vector<24x24xf32>
    %26 = arith.truncf %25 : vector<24x24xf32> to vector<24x24xbf16>
    %cst_10 = arith.constant dense<0.000000e+00> : vector<24x32xf32>
    %27 = tpu.matmul %26, %13, %cst_10 {dimension_numbers = #tpu.dot_dimension_numbers<[1], [0], [0], [1], [0, 0, 1, 1], [], []>} : vector<24x24xbf16>, vector<24x32xbf16>, vector<24x32xf32> -> vector<24x32xf32>
    %28 = arith.maximumf %20, %27 : vector<24x32xf32>
    %29 = vector.extract_strided_slice %11 {offsets = [0, 2], sizes = [24, 1], strides = [1, 1]} : vector<24x4xi32> to vector<24x1xi32>
    %30 = vector.broadcast %29 : vector<24x1xi32> to vector<24x24xi32>
    %31 = arith.cmpi eq, %12, %30 : vector<24x24xi32>
    %32 = arith.extui %31 : vector<24x24xi1> to vector<24x24xi32>
    %33 = arith.sitofp %32 : vector<24x24xi32> to vector<24x24xf32>
    %34 = arith.truncf %33 : vector<24x24xf32> to vector<24x24xbf16>
    %cst_11 = arith.constant dense<0.000000e+00> : vector<24x32xf32>
    %35 = tpu.matmul %34, %13, %cst_11 {dimension_numbers = #tpu.dot_dimension_numbers<[1], [0], [0], [1], [0, 0, 1, 1], [], []>} : vector<24x24xbf16>, vector<24x32xbf16>, vector<24x32xf32> -> vector<24x32xf32>
    %36 = arith.maximumf %28, %35 : vector<24x32xf32>
    %37 = vector.extract_strided_slice %11 {offsets = [0, 3], sizes = [24, 1], strides = [1, 1]} : vector<24x4xi32> to vector<24x1xi32>
    %38 = vector.broadcast %37 : vector<24x1xi32> to vector<24x24xi32>
    %39 = arith.cmpi eq, %12, %38 : vector<24x24xi32>
    %40 = arith.extui %39 : vector<24x24xi1> to vector<24x24xi32>
    %41 = arith.sitofp %40 : vector<24x24xi32> to vector<24x24xf32>
    %42 = arith.truncf %41 : vector<24x24xf32> to vector<24x24xbf16>
    %cst_12 = arith.constant dense<0.000000e+00> : vector<24x32xf32>
    %43 = tpu.matmul %42, %13, %cst_12 {dimension_numbers = #tpu.dot_dimension_numbers<[1], [0], [0], [1], [0, 0, 1, 1], [], []>} : vector<24x24xbf16>, vector<24x32xbf16>, vector<24x32xf32> -> vector<24x32xf32>
    %44 = arith.maximumf %36, %43 : vector<24x32xf32>
    %45 = arith.addf %44, %9 : vector<24x32xf32>
    %c0_13 = arith.constant 0 : index
    %c0_14 = arith.constant 0 : index
    %46 = vector.load %arg6[%c0_13, %c0_14] : memref<1x32xf32, #tpu.memory_space<vmem>>, vector<1x32xf32>
    %47 = vector.broadcast %46 : vector<1x32xf32> to vector<24x32xf32>
    %48 = arith.mulf %45, %47 : vector<24x32xf32>
    %c0_15 = arith.constant 0 : index
    %c0_16 = arith.constant 0 : index
    %49 = vector.load %arg7[%c0_15, %c0_16] : memref<1x32xf32, #tpu.memory_space<vmem>>, vector<1x32xf32>
    %50 = vector.broadcast %49 : vector<1x32xf32> to vector<24x32xf32>
    %51 = arith.addf %48, %50 : vector<24x32xf32>
    %cst_17 = arith.constant 0.000000e+00 : f32
    %52 = vector.broadcast %cst_17 : f32 to vector<24x32xf32>
    %53 = arith.cmpf oge, %51, %52 : vector<24x32xf32>
    %cst_18 = arith.constant 2.000000e-01 : f32
    %54 = vector.broadcast %cst_18 : f32 to vector<24x32xf32>
    %55 = arith.mulf %54, %51 : vector<24x32xf32>
    %56 = arith.select %53, %51, %55 : vector<24x32xi1>, vector<24x32xf32>
    %57 = arith.truncf %56 : vector<24x32xf32> to vector<24x32xbf16>
    %c0_19 = arith.constant 0 : index
    %c0_20 = arith.constant 0 : index
    %c0_21 = arith.constant 0 : index
    %58 = vector.load %arg8[%c0_19, %c0_20, %c0_21] : memref<1x24x32xbf16, #tpu.memory_space<vmem>>, vector<1x24x32xbf16>
    %59 = vector.shape_cast %58 : vector<1x24x32xbf16> to vector<24x32xbf16>
    %60 = vector.shape_cast %57 : vector<24x32xbf16> to vector<1x24x32xbf16>
    tpu.vector_store %arg8[%c0_19, %c0_20, %c0_21], %60 {strides = array<i32>} : memref<1x24x32xbf16, #tpu.memory_space<vmem>>, vector<1x24x32xbf16>,
    return
  }
  func.func @transform_0(%arg0: i32, %arg1: i32) -> (i32, i32, i32) {
    %c0_i32 = arith.constant 0 : i32
    %c0_i32_0 = arith.constant 0 : i32
    %c0_i32_1 = arith.constant 0 : i32
    return %arg0, %c0_i32, %c0_i32_0 : i32, i32, i32
  }
  func.func @transform_1(%arg0: i32, %arg1: i32) -> (i32, i32, i32) {
    %c0_i32 = arith.constant 0 : i32
    %c0_i32_0 = arith.constant 0 : i32
    return %arg0, %arg1, %c0_i32 : i32, i32, i32
  }
  func.func @transform_2(%arg0: i32, %arg1: i32) -> (i32, i32) {
    %c0_i32 = arith.constant 0 : i32
    %c0_i32_0 = arith.constant 0 : i32
    %c0_i32_1 = arith.constant 0 : i32
    return %c0_i32, %c0_i32_0 : i32, i32
  }
  func.func @transform_3(%arg0: i32, %arg1: i32) -> (i32, i32) {
    %c0_i32 = arith.constant 0 : i32
    %c0_i32_0 = arith.constant 0 : i32
    %c0_i32_1 = arith.constant 0 : i32
    return %c0_i32, %c0_i32_0 : i32, i32
  }
  func.func @transform_4(%arg0: i32, %arg1: i32) -> (i32, i32) {
    %c0_i32 = arith.constant 0 : i32
    %c0_i32_0 = arith.constant 0 : i32
    %c0_i32_1 = arith.constant 0 : i32
    return %c0_i32, %c0_i32_0 : i32, i32
  }
  func.func @transform_5(%arg0: i32, %arg1: i32) -> (i32, i32) {
    %c0_i32 = arith.constant 0 : i32
    %c0_i32_0 = arith.constant 0 : i32
    %c0_i32_1 = arith.constant 0 : i32
    return %c0_i32, %c0_i32_0 : i32, i32
  }
  func.func @transform_6(%arg0: i32, %arg1: i32) -> (i32, i32, i32) {
    %c0_i32 = arith.constant 0 : i32
    %c0_i32_0 = arith.constant 0 : i32
    return %arg0, %arg1, %c0_i32 : i32, i32, i32
  }
}

module attributes {stable_mosaic.version = 11 : i64} {
  func.func @_edgeconv_head_kernel(%arg0: i32, %arg1: i32, %arg2: memref<1x24x32xbf16, #tpu.memory_space<vmem>>, %arg3: memref<1x24x4xi32, #tpu.memory_space<vmem>>, %arg4: memref<32x32xbf16, #tpu.memory_space<vmem>>, %arg5: memref<32x32xbf16, #tpu.memory_space<vmem>>, %arg6: memref<1x32xf32, #tpu.memory_space<vmem>>, %arg7: memref<1x32xf32, #tpu.memory_space<vmem>>, %arg8: memref<32x64xf32, #tpu.memory_space<vmem>>, %arg9: memref<32x64xf32, #tpu.memory_space<vmem>>, %arg10: memref<1x64xf32, #tpu.memory_space<vmem>>, %arg11: memref<1x64xf32, #tpu.memory_space<vmem>>, %arg12: memref<64x10xf32, #tpu.memory_space<vmem>>, %arg13: memref<1x10xf32, #tpu.memory_space<vmem>>, %arg14: memref<1x1x10xf32, #tpu.memory_space<vmem>>, %arg15: memref<24x32xbf16, #tpu.memory_space<vmem>>, %arg16: memref<1x32xf32, #tpu.memory_space<vmem>>, %arg17: memref<1x32xf32, #tpu.memory_space<vmem>>) attributes {dimension_semantics = [#tpu.dimension_semantics<parallel>, #tpu.dimension_semantics<arbitrary>], iteration_bounds = array<i64: 2, 1>, scalar_prefetch = 0 : i64, scratch_operands = 3 : i64, tpu.core_type = #tpu.core_type<tc>, window_params = [{transform_indices = @transform_0, window_bounds = array<i64: 1, 24, 32>}, {transform_indices = @transform_1, window_bounds = array<i64: 1, 24, 4>}, {pipeline_mode = #tpu.pipeline_mode<synchronous>, transform_indices = @transform_2, window_bounds = array<i64: 32, 32>}, {pipeline_mode = #tpu.pipeline_mode<synchronous>, transform_indices = @transform_3, window_bounds = array<i64: 32, 32>}, {pipeline_mode = #tpu.pipeline_mode<synchronous>, transform_indices = @transform_4, window_bounds = array<i64: 1, 32>}, {pipeline_mode = #tpu.pipeline_mode<synchronous>, transform_indices = @transform_5, window_bounds = array<i64: 1, 32>}, {pipeline_mode = #tpu.pipeline_mode<synchronous>, transform_indices = @transform_6, window_bounds = array<i64: 32, 64>}, {pipeline_mode = #tpu.pipeline_mode<synchronous>, transform_indices = @transform_7, window_bounds = array<i64: 32, 64>}, {pipeline_mode = #tpu.pipeline_mode<synchronous>, transform_indices = @transform_8, window_bounds = array<i64: 1, 64>}, {pipeline_mode = #tpu.pipeline_mode<synchronous>, transform_indices = @transform_9, window_bounds = array<i64: 1, 64>}, {pipeline_mode = #tpu.pipeline_mode<synchronous>, transform_indices = @transform_10, window_bounds = array<i64: 64, 10>}, {pipeline_mode = #tpu.pipeline_mode<synchronous>, transform_indices = @transform_11, window_bounds = array<i64: 1, 10>}, {transform_indices = @transform_12, window_bounds = array<i64: 1, 1, 10>}]} {
    %c0_i32 = arith.constant 0 : i32
    %0 = arith.cmpi eq, %arg1, %c0_i32 : i32
    %1 = arith.extui %0 : i1 to i32
    %c0_i32_0 = arith.constant 0 : i32
    %2 = arith.cmpi ne, %1, %c0_i32_0 : i32
    scf.if %2 {
      %c0_34 = arith.constant 0 : index
      %c0_35 = arith.constant 0 : index
      %c0_36 = arith.constant 0 : index
      %84 = vector.load %arg2[%c0_34, %c0_35, %c0_36] : memref<1x24x32xbf16, #tpu.memory_space<vmem>>, vector<1x24x32xbf16>
      %85 = vector.shape_cast %84 : vector<1x24x32xbf16> to vector<24x32xbf16>
      %c0_37 = arith.constant 0 : index
      %c0_38 = arith.constant 0 : index
      %86 = vector.load %arg4[%c0_37, %c0_38] : memref<32x32xbf16, #tpu.memory_space<vmem>>, vector<32x32xbf16>
      %cst_39 = arith.constant dense<0.000000e+00> : vector<24x32xf32>
      %87 = tpu.matmul %85, %86, %cst_39 {dimension_numbers = #tpu.dot_dimension_numbers<[1], [0], [0], [1], [0, 0, 1, 1], [], []>} : vector<24x32xbf16>, vector<32x32xbf16>, vector<24x32xf32> -> vector<24x32xf32>
      %88 = arith.truncf %87 : vector<24x32xf32> to vector<24x32xbf16>
      %c0_40 = arith.constant 0 : index
      %c0_41 = arith.constant 0 : index
      %89 = vector.load %arg15[%c0_40, %c0_41] : memref<24x32xbf16, #tpu.memory_space<vmem>>, vector<24x32xbf16>
      tpu.vector_store %arg15[%c0_40, %c0_41], %88 {strides = array<i32>} : memref<24x32xbf16, #tpu.memory_space<vmem>>, vector<24x32xbf16>,
      %cst_42 = arith.constant 0xFF800000 : f32
      %90 = vector.broadcast %cst_42 : f32 to vector<1x32xf32>
      %c0_43 = arith.constant 0 : index
      %c0_44 = arith.constant 0 : index
      %91 = vector.load %arg16[%c0_43, %c0_44] : memref<1x32xf32, #tpu.memory_space<vmem>>, vector<1x32xf32>
      tpu.vector_store %arg16[%c0_43, %c0_44], %90 {strides = array<i32>} : memref<1x32xf32, #tpu.memory_space<vmem>>, vector<1x32xf32>,
      %cst_45 = arith.constant 0.000000e+00 : f32
      %92 = vector.broadcast %cst_45 : f32 to vector<1x32xf32>
      %c0_46 = arith.constant 0 : index
      %c0_47 = arith.constant 0 : index
      %93 = vector.load %arg17[%c0_46, %c0_47] : memref<1x32xf32, #tpu.memory_space<vmem>>, vector<1x32xf32>
      tpu.vector_store %arg17[%c0_46, %c0_47], %92 {strides = array<i32>} : memref<1x32xf32, #tpu.memory_space<vmem>>, vector<1x32xf32>,
    } else {
    }
    %c24_i32 = arith.constant 24 : i32
    %3 = arith.muli %arg1, %c24_i32 : i32
    %4 = tpu.assume_multiple %3, 8 : i32
    %c0 = arith.constant 0 : index
    %5 = arith.index_cast %4 : i32 to index
    %c0_1 = arith.constant 0 : index
    %6 = vector.load %arg2[%c0, %5, %c0_1] : memref<1x24x32xbf16, #tpu.memory_space<vmem>>, vector<1x24x32xbf16>
    %7 = vector.shape_cast %6 : vector<1x24x32xbf16> to vector<24x32xbf16>
    %c0_2 = arith.constant 0 : index
    %c0_3 = arith.constant 0 : index
    %8 = vector.load %arg5[%c0_2, %c0_3] : memref<32x32xbf16, #tpu.memory_space<vmem>>, vector<32x32xbf16>
    %cst = arith.constant dense<0.000000e+00> : vector<24x32xf32>
    %9 = tpu.matmul %7, %8, %cst {dimension_numbers = #tpu.dot_dimension_numbers<[1], [0], [0], [1], [0, 0, 1, 1], [], []>} : vector<24x32xbf16>, vector<32x32xbf16>, vector<24x32xf32> -> vector<24x32xf32>
    %c0_4 = arith.constant 0 : index
    %c0_5 = arith.constant 0 : index
    %c0_6 = arith.constant 0 : index
    %10 = vector.load %arg3[%c0_4, %c0_5, %c0_6] : memref<1x24x4xi32, #tpu.memory_space<vmem>>, vector<1x24x4xi32>
    %11 = vector.shape_cast %10 : vector<1x24x4xi32> to vector<24x4xi32>
    %12 = tpu.iota {dimensions = array<i32: 1>} : vector<24x24xi32>
    %c0_7 = arith.constant 0 : index
    %c0_8 = arith.constant 0 : index
    %13 = vector.load %arg15[%c0_7, %c0_8] : memref<24x32xbf16, #tpu.memory_space<vmem>>, vector<24x32xbf16>
    %14 = vector.extract_strided_slice %11 {offsets = [0, 0], sizes = [24, 1], strides = [1, 1]} : vector<24x4xi32> to vector<24x1xi32>
    %15 = vector.broadcast %14 : vector<24x1xi32> to vector<24x24xi32>
    %16 = arith.cmpi eq, %12, %15 : vector<24x24xi32>
    %17 = arith.extui %16 : vector<24x24xi1> to vector<24x24xi32>
    %18 = arith.sitofp %17 : vector<24x24xi32> to vector<24x24xf32>
    %19 = arith.truncf %18 : vector<24x24xf32> to vector<24x24xbf16>
    %cst_9 = arith.constant dense<0.000000e+00> : vector<24x32xf32>
    %20 = tpu.matmul %19, %13, %cst_9 {dimension_numbers = #tpu.dot_dimension_numbers<[1], [0], [0], [1], [0, 0, 1, 1], [], []>} : vector<24x24xbf16>, vector<24x32xbf16>, vector<24x32xf32> -> vector<24x32xf32>
    %21 = vector.extract_strided_slice %11 {offsets = [0, 1], sizes = [24, 1], strides = [1, 1]} : vector<24x4xi32> to vector<24x1xi32>
    %22 = vector.broadcast %21 : vector<24x1xi32> to vector<24x24xi32>
    %23 = arith.cmpi eq, %12, %22 : vector<24x24xi32>
    %24 = arith.extui %23 : vector<24x24xi1> to vector<24x24xi32>
    %25 = arith.sitofp %24 : vector<24x24xi32> to vector<24x24xf32>
    %26 = arith.truncf %25 : vector<24x24xf32> to vector<24x24xbf16>
    %cst_10 = arith.constant dense<0.000000e+00> : vector<24x32xf32>
    %27 = tpu.matmul %26, %13, %cst_10 {dimension_numbers = #tpu.dot_dimension_numbers<[1], [0], [0], [1], [0, 0, 1, 1], [], []>} : vector<24x24xbf16>, vector<24x32xbf16>, vector<24x32xf32> -> vector<24x32xf32>
    %28 = arith.maximumf %20, %27 : vector<24x32xf32>
    %29 = vector.extract_strided_slice %11 {offsets = [0, 2], sizes = [24, 1], strides = [1, 1]} : vector<24x4xi32> to vector<24x1xi32>
    %30 = vector.broadcast %29 : vector<24x1xi32> to vector<24x24xi32>
    %31 = arith.cmpi eq, %12, %30 : vector<24x24xi32>
    %32 = arith.extui %31 : vector<24x24xi1> to vector<24x24xi32>
    %33 = arith.sitofp %32 : vector<24x24xi32> to vector<24x24xf32>
    %34 = arith.truncf %33 : vector<24x24xf32> to vector<24x24xbf16>
    %cst_11 = arith.constant dense<0.000000e+00> : vector<24x32xf32>
    %35 = tpu.matmul %34, %13, %cst_11 {dimension_numbers = #tpu.dot_dimension_numbers<[1], [0], [0], [1], [0, 0, 1, 1], [], []>} : vector<24x24xbf16>, vector<24x32xbf16>, vector<24x32xf32> -> vector<24x32xf32>
    %36 = arith.maximumf %28, %35 : vector<24x32xf32>
    %37 = vector.extract_strided_slice %11 {offsets = [0, 3], sizes = [24, 1], strides = [1, 1]} : vector<24x4xi32> to vector<24x1xi32>
    %38 = vector.broadcast %37 : vector<24x1xi32> to vector<24x24xi32>
    %39 = arith.cmpi eq, %12, %38 : vector<24x24xi32>
    %40 = arith.extui %39 : vector<24x24xi1> to vector<24x24xi32>
    %41 = arith.sitofp %40 : vector<24x24xi32> to vector<24x24xf32>
    %42 = arith.truncf %41 : vector<24x24xf32> to vector<24x24xbf16>
    %cst_12 = arith.constant dense<0.000000e+00> : vector<24x32xf32>
    %43 = tpu.matmul %42, %13, %cst_12 {dimension_numbers = #tpu.dot_dimension_numbers<[1], [0], [0], [1], [0, 0, 1, 1], [], []>} : vector<24x24xbf16>, vector<24x32xbf16>, vector<24x32xf32> -> vector<24x32xf32>
    %44 = arith.maximumf %36, %43 : vector<24x32xf32>
    %45 = arith.addf %44, %9 : vector<24x32xf32>
    %c0_13 = arith.constant 0 : index
    %c0_14 = arith.constant 0 : index
    %46 = vector.load %arg6[%c0_13, %c0_14] : memref<1x32xf32, #tpu.memory_space<vmem>>, vector<1x32xf32>
    %47 = vector.broadcast %46 : vector<1x32xf32> to vector<24x32xf32>
    %48 = arith.mulf %45, %47 : vector<24x32xf32>
    %c0_15 = arith.constant 0 : index
    %c0_16 = arith.constant 0 : index
    %49 = vector.load %arg7[%c0_15, %c0_16] : memref<1x32xf32, #tpu.memory_space<vmem>>, vector<1x32xf32>
    %50 = vector.broadcast %49 : vector<1x32xf32> to vector<24x32xf32>
    %51 = arith.addf %48, %50 : vector<24x32xf32>
    %cst_17 = arith.constant 0.000000e+00 : f32
    %52 = vector.broadcast %cst_17 : f32 to vector<24x32xf32>
    %53 = arith.cmpf oge, %51, %52 : vector<24x32xf32>
    %cst_18 = arith.constant 2.000000e-01 : f32
    %54 = vector.broadcast %cst_18 : f32 to vector<24x32xf32>
    %55 = arith.mulf %54, %51 : vector<24x32xf32>
    %56 = arith.select %53, %51, %55 : vector<24x32xi1>, vector<24x32xf32>
    %57 = tpu.iota {dimensions = array<i32: 0>} : vector<24x1xi32>
    %c24_i32_19 = arith.constant 24 : i32
    %58 = arith.muli %arg1, %c24_i32_19 : i32
    %59 = vector.broadcast %58 : i32 to vector<24x1xi32>
    %60 = arith.addi %57, %59 : vector<24x1xi32>
    %c20_i32 = arith.constant 20 : i32
    %61 = vector.broadcast %c20_i32 : i32 to vector<24x1xi32>
    %62 = arith.cmpi slt, %60, %61 : vector<24x1xi32>
    %cst_20 = arith.constant 0xFF800000 : f32
    %63 = vector.shape_cast %62 : vector<24x1xi1> to vector<24x1xi1>
    %64 = vector.broadcast %63 : vector<24x1xi1> to vector<24x32xi1>
    %65 = vector.broadcast %cst_20 : f32 to vector<24x32xf32>
    %66 = arith.select %64, %56, %65 : vector<24x32xi1>, vector<24x32xf32>
    %cst_21 = arith.constant 0.000000e+00 : f32
    %67 = vector.shape_cast %62 : vector<24x1xi1> to vector<24x1xi1>
    %68 = vector.broadcast %67 : vector<24x1xi1> to vector<24x32xi1>
    %69 = vector.broadcast %cst_21 : f32 to vector<24x32xf32>
    %70 = arith.select %68, %56, %69 : vector<24x32xi1>, vector<24x32xf32>
    %c0_22 = arith.constant 0 : index
    %c0_23 = arith.constant 0 : index
    %71 = vector.load %arg16[%c0_22, %c0_23] : memref<1x32xf32, #tpu.memory_space<vmem>>, vector<1x32xf32>
    %cst_24 = arith.constant dense<0xFF800000> : vector<32xf32>
    %72 = vector.multi_reduction <maximumf>, %66, %cst_24 [0] : vector<24x32xf32> to vector<32xf32>
    %73 = vector.shape_cast %72 : vector<32xf32> to vector<1x32xf32>
    %74 = arith.maximumf %71, %73 : vector<1x32xf32>
    %c0_25 = arith.constant 0 : index
    %c0_26 = arith.constant 0 : index
    %75 = vector.load %arg16[%c0_25, %c0_26] : memref<1x32xf32, #tpu.memory_space<vmem>>, vector<1x32xf32>
    tpu.vector_store %arg16[%c0_25, %c0_26], %74 {strides = array<i32>} : memref<1x32xf32, #tpu.memory_space<vmem>>, vector<1x32xf32>,
    %c0_27 = arith.constant 0 : index
    %c0_28 = arith.constant 0 : index
    %76 = vector.load %arg17[%c0_27, %c0_28] : memref<1x32xf32, #tpu.memory_space<vmem>>, vector<1x32xf32>
    %cst_29 = arith.constant dense<0.000000e+00> : vector<32xf32>
    %77 = vector.multi_reduction <add>, %70, %cst_29 [0] : vector<24x32xf32> to vector<32xf32>
    %78 = vector.shape_cast %77 : vector<32xf32> to vector<1x32xf32>
    %79 = arith.addf %76, %78 : vector<1x32xf32>
    %c0_30 = arith.constant 0 : index
    %c0_31 = arith.constant 0 : index
    %80 = vector.load %arg17[%c0_30, %c0_31] : memref<1x32xf32, #tpu.memory_space<vmem>>, vector<1x32xf32>
    tpu.vector_store %arg17[%c0_30, %c0_31], %79 {strides = array<i32>} : memref<1x32xf32, #tpu.memory_space<vmem>>, vector<1x32xf32>,
    %c0_i32_32 = arith.constant 0 : i32
    %81 = arith.cmpi eq, %arg1, %c0_i32_32 : i32
    %82 = arith.extui %81 : i1 to i32
    %c0_i32_33 = arith.constant 0 : i32
    %83 = arith.cmpi ne, %82, %c0_i32_33 : i32
    scf.if %83 {
      %c0_34 = arith.constant 0 : index
      %c0_35 = arith.constant 0 : index
      %84 = vector.load %arg16[%c0_34, %c0_35] : memref<1x32xf32, #tpu.memory_space<vmem>>, vector<1x32xf32>
      %c0_36 = arith.constant 0 : index
      %c0_37 = arith.constant 0 : index
      %85 = vector.load %arg17[%c0_36, %c0_37] : memref<1x32xf32, #tpu.memory_space<vmem>>, vector<1x32xf32>
      %cst_38 = arith.constant 5.000000e-02 : f32
      %86 = vector.broadcast %cst_38 : f32 to vector<1x32xf32>
      %87 = arith.mulf %85, %86 : vector<1x32xf32>
      %c0_39 = arith.constant 0 : index
      %c0_40 = arith.constant 0 : index
      %88 = vector.load %arg8[%c0_39, %c0_40] : memref<32x64xf32, #tpu.memory_space<vmem>>, vector<32x64xf32>
      %cst_41 = arith.constant dense<0.000000e+00> : vector<1x64xf32>
      %89 = tpu.matmul %84, %88, %cst_41 {dimension_numbers = #tpu.dot_dimension_numbers<[1], [0], [0], [1], [0, 0, 1, 1], [], []>} : vector<1x32xf32>, vector<32x64xf32>, vector<1x64xf32> -> vector<1x64xf32>
      %c0_42 = arith.constant 0 : index
      %c0_43 = arith.constant 0 : index
      %90 = vector.load %arg9[%c0_42, %c0_43] : memref<32x64xf32, #tpu.memory_space<vmem>>, vector<32x64xf32>
      %cst_44 = arith.constant dense<0.000000e+00> : vector<1x64xf32>
      %91 = tpu.matmul %87, %90, %cst_44 {dimension_numbers = #tpu.dot_dimension_numbers<[1], [0], [0], [1], [0, 0, 1, 1], [], []>} : vector<1x32xf32>, vector<32x64xf32>, vector<1x64xf32> -> vector<1x64xf32>
      %92 = arith.addf %89, %91 : vector<1x64xf32>
      %c0_45 = arith.constant 0 : index
      %c0_46 = arith.constant 0 : index
      %93 = vector.load %arg10[%c0_45, %c0_46] : memref<1x64xf32, #tpu.memory_space<vmem>>, vector<1x64xf32>
      %94 = arith.mulf %92, %93 : vector<1x64xf32>
      %c0_47 = arith.constant 0 : index
      %c0_48 = arith.constant 0 : index
      %95 = vector.load %arg11[%c0_47, %c0_48] : memref<1x64xf32, #tpu.memory_space<vmem>>, vector<1x64xf32>
      %96 = arith.addf %94, %95 : vector<1x64xf32>
      %c0_49 = arith.constant 0 : index
      %c0_50 = arith.constant 0 : index
      %97 = vector.load %arg12[%c0_49, %c0_50] : memref<64x10xf32, #tpu.memory_space<vmem>>, vector<64x10xf32>
      %cst_51 = arith.constant dense<0.000000e+00> : vector<1x10xf32>
      %98 = tpu.matmul %96, %97, %cst_51 {dimension_numbers = #tpu.dot_dimension_numbers<[1], [0], [0], [1], [0, 0, 1, 1], [], []>} : vector<1x64xf32>, vector<64x10xf32>, vector<1x10xf32> -> vector<1x10xf32>
      %c0_52 = arith.constant 0 : index
      %c0_53 = arith.constant 0 : index
      %99 = vector.load %arg13[%c0_52, %c0_53] : memref<1x10xf32, #tpu.memory_space<vmem>>, vector<1x10xf32>
      %100 = arith.addf %98, %99 : vector<1x10xf32>
      %c0_54 = arith.constant 0 : index
      %c0_55 = arith.constant 0 : index
      %c0_56 = arith.constant 0 : index
      %101 = vector.load %arg14[%c0_54, %c0_55, %c0_56] : memref<1x1x10xf32, #tpu.memory_space<vmem>>, vector<1x1x10xf32>
      %102 = vector.shape_cast %101 : vector<1x1x10xf32> to vector<1x10xf32>
      %103 = vector.shape_cast %100 : vector<1x10xf32> to vector<1x1x10xf32>
      tpu.vector_store %arg14[%c0_54, %c0_55, %c0_56], %103 {strides = array<i32>} : memref<1x1x10xf32, #tpu.memory_space<vmem>>, vector<1x1x10xf32>,
    } else {
    }
    return
  }
  func.func @transform_0(%arg0: i32, %arg1: i32) -> (i32, i32, i32) {
    %c0_i32 = arith.constant 0 : i32
    %c0_i32_0 = arith.constant 0 : i32
    %c0_i32_1 = arith.constant 0 : i32
    return %arg0, %c0_i32, %c0_i32_0 : i32, i32, i32
  }
  func.func @transform_1(%arg0: i32, %arg1: i32) -> (i32, i32, i32) {
    %c0_i32 = arith.constant 0 : i32
    %c0_i32_0 = arith.constant 0 : i32
    return %arg0, %arg1, %c0_i32 : i32, i32, i32
  }
  func.func @transform_2(%arg0: i32, %arg1: i32) -> (i32, i32) {
    %c0_i32 = arith.constant 0 : i32
    %c0_i32_0 = arith.constant 0 : i32
    %c0_i32_1 = arith.constant 0 : i32
    return %c0_i32, %c0_i32_0 : i32, i32
  }
  func.func @transform_3(%arg0: i32, %arg1: i32) -> (i32, i32) {
    %c0_i32 = arith.constant 0 : i32
    %c0_i32_0 = arith.constant 0 : i32
    %c0_i32_1 = arith.constant 0 : i32
    return %c0_i32, %c0_i32_0 : i32, i32
  }
  func.func @transform_4(%arg0: i32, %arg1: i32) -> (i32, i32) {
    %c0_i32 = arith.constant 0 : i32
    %c0_i32_0 = arith.constant 0 : i32
    %c0_i32_1 = arith.constant 0 : i32
    return %c0_i32, %c0_i32_0 : i32, i32
  }
  func.func @transform_5(%arg0: i32, %arg1: i32) -> (i32, i32) {
    %c0_i32 = arith.constant 0 : i32
    %c0_i32_0 = arith.constant 0 : i32
    %c0_i32_1 = arith.constant 0 : i32
    return %c0_i32, %c0_i32_0 : i32, i32
  }
  func.func @transform_6(%arg0: i32, %arg1: i32) -> (i32, i32) {
    %c0_i32 = arith.constant 0 : i32
    %c0_i32_0 = arith.constant 0 : i32
    %c0_i32_1 = arith.constant 0 : i32
    return %c0_i32, %c0_i32_0 : i32, i32
  }
  func.func @transform_7(%arg0: i32, %arg1: i32) -> (i32, i32) {
    %c0_i32 = arith.constant 0 : i32
    %c0_i32_0 = arith.constant 0 : i32
    %c0_i32_1 = arith.constant 0 : i32
    return %c0_i32, %c0_i32_0 : i32, i32
  }
  func.func @transform_8(%arg0: i32, %arg1: i32) -> (i32, i32) {
    %c0_i32 = arith.constant 0 : i32
    %c0_i32_0 = arith.constant 0 : i32
    %c0_i32_1 = arith.constant 0 : i32
    return %c0_i32, %c0_i32_0 : i32, i32
  }
  func.func @transform_9(%arg0: i32, %arg1: i32) -> (i32, i32) {
    %c0_i32 = arith.constant 0 : i32
    %c0_i32_0 = arith.constant 0 : i32
    %c0_i32_1 = arith.constant 0 : i32
    return %c0_i32, %c0_i32_0 : i32, i32
  }
  func.func @transform_10(%arg0: i32, %arg1: i32) -> (i32, i32) {
    %c0_i32 = arith.constant 0 : i32
    %c0_i32_0 = arith.constant 0 : i32
    %c0_i32_1 = arith.constant 0 : i32
    return %c0_i32, %c0_i32_0 : i32, i32
  }
  func.func @transform_11(%arg0: i32, %arg1: i32) -> (i32, i32) {
    %c0_i32 = arith.constant 0 : i32
    %c0_i32_0 = arith.constant 0 : i32
    %c0_i32_1 = arith.constant 0 : i32
    return %c0_i32, %c0_i32_0 : i32, i32
  }
  func.func @transform_12(%arg0: i32, %arg1: i32) -> (i32, i32, i32) {
    %c0_i32 = arith.constant 0 : i32
    %c0_i32_0 = arith.constant 0 : i32
    %c0_i32_1 = arith.constant 0 : i32
    return %arg0, %c0_i32, %c0_i32_0 : i32, i32, i32
  }
}

</mosaic_0001>

<bundles_post_ra>
// kernel: model_forward.3
= control target key start
LH: loop header
LB: loop body
LE: loop exit
PB: predicated region body
PF: predicated region fallthrough
CT: control target
= control target key end

     0   :  { %s752_s9 = smov 0   ;;  %s754_s10 = smov 0   ;;  %s941_s0 = inlined_call_operand.vmem [shape: f32[2,24,3], index: 0, kind: input, shape index: {}]   ;;  %s942_s1 = inlined_call_operand.vmem [shape: f32[2,3,24], index: 1, kind: input, shape index: {}]   ;;  %s943_s2 = inlined_call_operand.vmem [shape: s32[2,24,4], index: 2, kind: output, shape index: {}]  }
   0x1   :  { %s756_s11 = smov 0  }
   0x2 LB: > { %s24_s12 = sadd.s32 1, %s728_s10  ;;  %p670_p0 = scmp.ge.s32.totalorder %s732_s11, 1  ;;  %s732_s11 = sphi %s756_s11, %s12_s11   ;;  %s728_s10 = sphi %s754_s10, %s945_s10   ;;  %s724_s9 = sphi %s752_s9, %s944_s9  }
   0x3   : > { %p26_p1 = scmp.ge.s32.totalorder %s24_s12, 2  ;;  %p142_p2 = scmp.lt.s32.totalorder %s732_s11, 3 }
   0x5   : > { %s947_s12 = smov (%p26_p1, %s24_s12), 0  ;;  %p143_p3 = pnand %p670_p0, %p142_p2 }
   0x6   : > { %p177_p4 = scmp.lt.s32.totalorder (!%p143_p3), %s724_s9, 1  ;;  %v734_v0 = vmov (!%p143_p3), 0   ;;  %v735_v4 = vmov (!%p143_p3), 1   ;;  %v736_v5 = vmov (!%p143_p3), 2   ;;  %v219_v6 = vlaneseq (!%p143_p3) }
   0x7   : > { %146 = sbr.rel (%p143_p3) target bundleno = 1941 (0x795), region = 28  ;;  %705 = vset.pattern.permute.xlu1 (!%p143_p3), %v734_v0  ;;  %704 = vset.pattern.permute.xlu0 (!%p143_p3), %v734_v0  ;;  %vm288_vm1 = vcmask (!%p143_p3), 195584  }
   0x8   : > { %v220_v7 = vshrl.u32 (!%p143_p3), %v219_v6, 7  ;;  %v782_v28 = vand.u32 (!%p143_p3), 127, %v219_v6 }
   0xa   : > { %v246_v10 = vsub.s32 (!%p143_p3), 1, %v220_v7  ;;  %v221_v11 = vsub.s32 (!%p143_p3), 0, %v220_v7  ;;  %v271_v17 = vsub.s32 (!%p143_p3), 2, %v220_v7  ;;  %vm284_vm0 = vcmp.lt.s32.totalorder (!%p143_p3), %v782_v28, 20 }
   0xe   : > { %s949_s9 = smov (!%p177_p4, %s724_s9), 1 }
   0xf   : > { %s676_s13 = smul.u32 24, %s949_s9  ;;  %s672_s17 = sshll.u32 %s949_s9, 2 }
  0x10   : > { %s189_s20 = scalar_lea.vmem %s942_s1, %s672_s17 }
  0x11   : > { %s184_s16 = scalar_lea.vmem %s941_s0, %s676_s13  ;;  %v203_v12 = vld [vmem:[%s189_s20] sm:$0x7]  ;;  %s198_s23 = scalar_lea.vmem %s943_s2, %s676_s13 }
  0x12   : > { %v202_v1 = vld [vmem:[%s184_s16 + $0x10] sm:$0xff]  ;;  %v200_v2 = vld [vmem:[%s184_s16] sm:$0xff]  ;;  %v201_v3 = vld [vmem:[%s184_s16 + $0x8] sm:$0xff]  ;;  %v247_v14 = vrot.slane %v203_v12, %v246_v10  ;;  %v222_v16 = vrot.slane %v203_v12, %v221_v11  ;;  %v272_v24 = vrot.slane %v203_v12, %v271_v17 }
  0x13   : > { %216 = vperm.xlu1 %705, %v202_v1   ;;  %206 = vperm.xlu0 %704, %v200_v2  }
  0x17   : > { %706 = vset.pattern.permute.xlu1 %v735_v4  ;;  %211 = vperm.xlu0 %704, %v201_v3  }
  0x18   : > { %233 = vperm.xlu1 %706, %v200_v2  }
  0x1b   : > { %707 = vset.pattern.permute.xlu0 %v735_v4 }
  0x1c   : > { %241 = vperm.xlu1 %706, %v202_v1   ;;  %237 = vperm.xlu0 %707, %v201_v3  }
  0x20   : > { %708 = vset.pattern.permute.xlu1 %v736_v5  ;;  %709 = vset.pattern.permute.xlu0 %v736_v5 }
  0x21   : > { %258 = vperm.xlu1 %708, %v200_v2   ;;  %262 = vperm.xlu0 %709, %v201_v3  }
  0x25   : > { %266 = vperm.xlu1 %708, %v202_v1  }
  0x92   : > { %v217_v8 = vpop.permute.xlu1 %216  ;;  %v207_v9 = vpop.permute.xlu0 %206 }
  0x93   : > { %v223_v21 = vsub.f32 %v207_v9, %v222_v16  ;;  %v225_v32 = vsub.f32 %v217_v8, %v222_v16 }
  0x95   : > { %v226_v29 = vmul.f32 %v223_v21, %v223_v21  ;;  %v228_v42 = vmul.f32 %v225_v32, %v225_v32 }
  0x96   : > { %v212_v13 = vpop.permute.xlu0 %211 }
  0x97   : > { %v234_v15 = vpop.permute.xlu1 %233  ;;  %v224_v23 = vsub.f32 %v212_v13, %v222_v16 }
  0x98   : > { %v248_v18 = vsub.f32 %v234_v15, %v247_v14 }
  0x99   : > { %v227_v33 = vmul.f32 %v224_v23, %v224_v23 }
  0x9a   : > { %v251_v25 = vmul.f32 %v248_v18, %v248_v18 }
  0x9b   : > { %v242_v19 = vpop.permute.xlu1 %241  ;;  %v238_v20 = vpop.permute.xlu0 %237 }
  0x9c   : > { %v249_v22 = vsub.f32 %v238_v20, %v247_v14  ;;  %v250_v26 = vsub.f32 %v242_v19, %v247_v14  ;;  %v254_v36 = vadd.f32 %v251_v25, %v226_v29 }
  0x9e   : > { %v252_v27 = vmul.f32 %v249_v22, %v249_v22  ;;  %v253_v37 = vmul.f32 %v250_v26, %v250_v26 }
  0xa0   : > { %v259_v30 = vpop.permute.xlu1 %258  ;;  %v263_v31 = vpop.permute.xlu0 %262  ;;  %v255_v38 = vadd.f32 %v252_v27, %v227_v33  ;;  %v256_v46 = vadd.f32 %v253_v37, %v228_v42 }
  0xa1   : > { %v273_v34 = vsub.f32 %v259_v30, %v272_v24  ;;  %v274_v35 = vsub.f32 %v263_v31, %v272_v24 }
  0xa3   : > { %v276_v39 = vmul.f32 %v273_v34, %v273_v34  ;;  %v277_v40 = vmul.f32 %v274_v35, %v274_v35 }
  0xa4   : > { %v267_v41 = vpop.permute.xlu1 %266 }
  0xa5   : > { %v279_v43 = vadd.f32 %v276_v39, %v254_v36  ;;  %v280_v44 = vadd.f32 %v277_v40, %v255_v38  ;;  %v275_v45 = vsub.f32 %v267_v41, %v272_v24 }
  0xa7   : > { %v278_v47 = vmul.f32 %v275_v45, %v275_v45  ;;  %v785_v48 = vsel %vm284_vm0, %v279_v43, inf  ;;  %v787_v49 = vsel %vm284_vm0, %v280_v44, inf }
  0xa8   : > { %v289_v50 = vsel %vm288_vm1, %v785_v48, inf  ;;  %v292_v51 = vsel %vm288_vm1, %v787_v49, inf }
  0xa9   : > { %v281_v52 = vadd.f32 %v278_v47, %v256_v46  ;;  %290 = vmin.xlane.f32.xlu1 %v289_v50  ;;  %293 = vmin.xlane.f32.xlu0 %v292_v51 }
  0xab   : > { %v793_v53 = vsel %vm284_vm0, %v281_v52, inf }
  0xac   : > { %v295_v54 = vsel %vm288_vm1, %v793_v53, inf }
  0xad   : > { %296 = vmin.xlane.f32.xlu0 %v295_v54 }
 0x136   : > { %v291_v55 = vpop.xlane.xlu1 %290  ;;  %v294_v56 = vpop.xlane.xlu0 %293 }
 0x137   : > { %vm298_vm2 = vcmp.le.f32.partialorder %v785_v48, %v291_v55  ;;  %vm299_vm3 = vcmp.le.f32.partialorder %v787_v49, %v294_v56 }
 0x138   : > { %v301_v57 = vsel %vm298_vm2, %v782_v28, 24  ;;  %v302_v58 = vsel %vm299_vm3, %v782_v28, 24  ;;  %vm349_vm2 = vcmp.eq.s32.totalorder %v782_v28, 0  ;;  %vm419_vm3 = vcmp.eq.s32.totalorder %v782_v28, 1 }
 0x139   : > { %v304_v59 = vsel %vm288_vm1, %v301_v57, 2147483647  ;;  %v319_v60 = vsel %vm288_vm1, %v302_v58, 2147483647 }
 0x13a   : > { %v297_v61 = vpop.xlane.xlu0 %296  ;;  %v306_v62 = vshra.s32 %v304_v59, 16  ;;  %v321_v63 = vshra.s32 %v319_v60, 16  ;;  %v305_v6 = vand.u32 65535, %v304_v59  ;;  %v320_v7 = vand.u32 65535, %v319_v60 }
 0x13b   : > { %vm300_vm4 = vcmp.le.f32.partialorder %v793_v53, %v297_v61 }
 0x13c   : > { %v303_v0 = vsel %vm300_vm4, %v782_v28, 24  ;;  %v308_v1 = vcvt.s32.f32 %v306_v62  ;;  %v323_v2 = vcvt.s32.f32 %v321_v63  ;;  %v307_v10 = vcvt.s32.f32 %v305_v6 }
 0x13d   : > { %v334_v3 = vsel %vm288_vm1, %v303_v0, 2147483647  ;;  %v322_v11 = vcvt.s32.f32 %v320_v7 }
 0x13e   : > { %309 = vmin.xlane.f32.xlu1 %v308_v1  ;;  %324 = vmin.xlane.f32.xlu0 %v323_v2  ;;  %v336_v4 = vshra.s32 %v334_v3, 16  ;;  %v335_v12 = vand.u32 65535, %v334_v3 }
 0x140   : > { %v338_v5 = vcvt.s32.f32 %v336_v4  ;;  %v337_v16 = vcvt.s32.f32 %v335_v12 }
 0x142   : > { %339 = vmin.xlane.f32.xlu1 %v338_v5 }
 0x1cb   : > { %v310_v8 = vpop.xlane.xlu1 %309  ;;  %v325_v9 = vpop.xlane.xlu0 %324 }
 0x1cc   : > { %vm311_vm5 = vcmp.eq.f32.partialorder %v308_v1, %v310_v8  ;;  %vm326_vm6 = vcmp.eq.f32.partialorder %v323_v2, %v325_v9  ;;  %v316_v18 = vcvt.f32.s32 %v310_v8  ;;  %v331_v19 = vcvt.f32.s32 %v325_v9 }
 0x1cd   : > { %v312_v13 = vsel %vm311_vm5, %v307_v10, inf  ;;  %v327_v14 = vsel %vm326_vm6, %v322_v11, inf }
 0x1ce   : > { %313 = vmin.xlane.f32.xlu0 %v312_v13  ;;  %328 = vmin.xlane.f32.xlu1 %v327_v14  ;;  %v317_v20 = vshll.u32 %v316_v18, 16  ;;  %v332_v23 = vshll.u32 %v331_v19, 16 }
 0x1cf   : > { %v340_v15 = vpop.xlane.xlu1 %339 }
 0x1d0   : > { %vm341_vm7 = vcmp.eq.f32.partialorder %v338_v5, %v340_v15  ;;  %v346_v24 = vcvt.f32.s32 %v340_v15 }
 0x1d1   : > { %v342_v17 = vsel %vm341_vm7, %v337_v16, inf }
 0x1d2   : > { %343 = vmin.xlane.f32.xlu0 %v342_v17  ;;  %v347_v31 = vshll.u32 %v346_v24, 16 }
 0x25b   : > { %v329_v21 = vpop.xlane.xlu1 %328  ;;  %v314_v22 = vpop.xlane.xlu0 %313 }
 0x25c   : > { %v330_v25 = vcvt.f32.s32 %v329_v21  ;;  %v315_v26 = vcvt.f32.s32 %v314_v22 }
 0x25e   : > { %v806_v27 = vadd.s32 %v332_v23, %v330_v25  ;;  %v808_v29 = vadd.s32 %v317_v20, %v315_v26 }
 0x25f   : > { %v344_v30 = vpop.xlane.xlu0 %343 }
 0x260   : > { %v345_v32 = vcvt.f32.s32 %v344_v30  ;;  %vm354_vm8 = vcmp.eq.s32.totalorder %v782_v28, %v806_v27  ;;  %vm353_vm9 = vcmp.eq.s32.totalorder %v782_v28, %v808_v29  ;;  %v351_v13 = vsel %vm349_vm2, %v806_v27, 0 }
 0x261   : > { %v813_v33 = vsel %vm354_vm8, inf, %v787_v49  ;;  %v822_v36 = vsel %vm353_vm9, inf, %v785_v48  ;;  %v350_v15 = vsel %vm349_vm2, %v808_v29, 0 }
 0x262   : > { %v817_v34 = vadd.s32 %v347_v31, %v345_v32  ;;  %v362_v35 = vsel %vm288_vm1, %v813_v33, inf  ;;  %v359_v37 = vsel %vm288_vm1, %v822_v36, inf }
 0x263   : > { %363 = vmin.xlane.f32.xlu0 %v362_v35  ;;  %360 = vmin.xlane.f32.xlu1 %v359_v37 }
 0x264   : > { %vm355_vm10 = vcmp.eq.s32.totalorder %v782_v28, %v817_v34  ;;  %v352_v26 = vsel %vm349_vm2, %v817_v34, 0 }
 0x265   : > { %v829_v38 = vsel %vm355_vm10, inf, %v793_v53 }
 0x266   : > { %v365_v39 = vsel %vm288_vm1, %v829_v38, inf }
 0x267   : > { %366 = vmin.xlane.f32.xlu1 %v365_v39 }
 0x2f0   : > { %v364_v40 = vpop.xlane.xlu0 %363  ;;  %v361_v41 = vpop.xlane.xlu1 %360 }
 0x2f1   : > { %vm369_vm11 = vcmp.le.f32.partialorder %v813_v33, %v364_v40  ;;  %vm368_vm12 = vcmp.le.f32.partialorder %v822_v36, %v361_v41 }
 0x2f2   : > { %v372_v42 = vsel %vm369_vm11, %v782_v28, 24  ;;  %v371_v43 = vsel %vm368_vm12, %v782_v28, 24 }
 0x2f3   : > { %v389_v44 = vsel %vm288_vm1, %v372_v42, 2147483647  ;;  %v374_v45 = vsel %vm288_vm1, %v371_v43, 2147483647 }
 0x2f4   : > { %v391_v46 = vshra.s32 %v389_v44, 16  ;;  %v367_v47 = vpop.xlane.xlu1 %366  ;;  %v376_v48 = vshra.s32 %v374_v45, 16  ;;  %v390_v55 = vand.u32 65535, %v389_v44  ;;  %v375_v56 = vand.u32 65535, %v374_v45 }
 0x2f5   : > { %vm370_vm13 = vcmp.le.f32.partialorder %v829_v38, %v367_v47 }
 0x2f6   : > { %v393_v49 = vcvt.s32.f32 %v391_v46  ;;  %v373_v50 = vsel %vm370_vm13, %v782_v28, 24  ;;  %v378_v51 = vcvt.s32.f32 %v376_v48  ;;  %v392_v58 = vcvt.s32.f32 %v390_v55 }
 0x2f7   : > { %v404_v52 = vsel %vm288_vm1, %v373_v50, 2147483647  ;;  %v377_v60 = vcvt.s32.f32 %v375_v56  ;;  %vm489_vm13 = vcmp.eq.s32.totalorder %v782_v28, 2 }
 0x2f8   : > { %394 = vmin.xlane.f32.xlu1 %v393_v49  ;;  %379 = vmin.xlane.f32.xlu0 %v378_v51  ;;  %v406_v53 = vshra.s32 %v404_v52, 16  ;;  %v405_v61 = vand.u32 65535, %v404_v52 }
 0x2fa   : > { %v408_v54 = vcvt.s32.f32 %v406_v53  ;;  %v407_v1 = vcvt.s32.f32 %v405_v61 }
 0x2fc   : > { %409 = vmin.xlane.f32.xlu0 %v408_v54 }
 0x385   : > { %v395_v57 = vpop.xlane.xlu1 %394  ;;  %v380_v59 = vpop.xlane.xlu0 %379 }
 0x386   : > { %vm396_vm14 = vcmp.eq.f32.partialorder %v393_v49, %v395_v57  ;;  %vm381_vm15 = vcmp.eq.f32.partialorder %v378_v51, %v380_v59  ;;  %v401_v3 = vcvt.f32.s32 %v395_v57  ;;  %v386_v4 = vcvt.f32.s32 %v380_v59 }
 0x387   : > { %v397_v62 = vsel %vm396_vm14, %v392_v58, inf  ;;  %v382_v63 = vsel %vm381_vm15, %v377_v60, inf }
 0x388   : > { %398 = vmin.xlane.f32.xlu0 %v397_v62  ;;  %383 = vmin.xlane.f32.xlu1 %v382_v63  ;;  %v402_v6 = vshll.u32 %v401_v3, 16  ;;  %v387_v10 = vshll.u32 %v386_v4, 16 }
 0x389   : > { %v410_v0 = vpop.xlane.xlu0 %409 }
 0x38a   : > { %vm411_vm0 = vcmp.eq.f32.partialorder %v408_v54, %v410_v0  ;;  %v416_v7 = vcvt.f32.s32 %v410_v0 }
 0x38b   : > { %v412_v2 = vsel %vm411_vm0, %v407_v1, inf }
 0x38c   : > { %413 = vmin.xlane.f32.xlu1 %v412_v2  ;;  %v417_v16 = vshll.u32 %v416_v7, 16 }
 0x415   : > { %v399_v5 = vpop.xlane.xlu0 %398  ;;  %v384_v8 = vpop.xlane.xlu1 %383 }
 0x416   : > { %v400_v9 = vcvt.f32.s32 %v399_v5  ;;  %v385_v11 = vcvt.f32.s32 %v384_v8 }
 0x418   : > { %v403_v12 = vadd.s32 %v402_v6, %v400_v9  ;;  %v388_v14 = vadd.s32 %v387_v10, %v385_v11 }
 0x419   : > { %v414_v18 = vpop.xlane.xlu1 %413 }
 0x41a   : > { %v852_v17 = vsel %vm419_vm3, %v403_v12, %v351_v13  ;;  %vm424_vm4 = vcmp.eq.s32.totalorder %v782_v28, %v403_v12  ;;  %v857_v19 = vsel %vm419_vm3, %v388_v14, %v350_v15  ;;  %v415_v20 = vcvt.f32.s32 %v414_v18 }
 0x41b   : > { %vm423_vm5 = vcmp.eq.s32.totalorder %v782_v28, %v388_v14  ;;  %v861_v21 = vsel %vm424_vm4, inf, %v813_v33 }
 0x41c   : > { %v864_v22 = vsel %vm423_vm5, inf, %v822_v36  ;;  %v432_v23 = vsel %vm288_vm1, %v861_v21, inf  ;;  %v418_v24 = vadd.s32 %v417_v16, %v415_v20 }
 0x41d   : > { %v429_v25 = vsel %vm288_vm1, %v864_v22, inf  ;;  %433 = vmin.xlane.f32.xlu1 %v432_v23 }
 0x41e   : > { %430 = vmin.xlane.f32.xlu0 %v429_v25  ;;  %v875_v27 = vsel %vm419_vm3, %v418_v24, %v352_v26  ;;  %vm425_vm6 = vcmp.eq.s32.totalorder %v782_v28, %v418_v24 }
 0x41f   : > { %v879_v29 = vsel %vm425_vm6, inf, %v829_v38 }
 0x420   : > { %v435_v30 = vsel %vm288_vm1, %v879_v29, inf }
 0x422   : > { %436 = vmin.xlane.f32.xlu0 %v435_v30 }
 0x4aa   : > { %v434_v31 = vpop.xlane.xlu1 %433 }
 0x4ab   : > { %vm439_vm7 = vcmp.le.f32.partialorder %v861_v21, %v434_v31  ;;  %v431_v32 = vpop.xlane.xlu0 %430 }
 0x4ac   : > { %v442_v33 = vsel %vm439_vm7, %v782_v28, 24  ;;  %vm438_vm8 = vcmp.le.f32.partialorder %v864_v22, %v431_v32  ;;  %vm559_vm7 = vcmp.eq.s32.totalorder %v782_v28, 3 }
 0x4ad   : > { %v459_v34 = vsel %vm288_vm1, %v442_v33, 2147483647  ;;  %v441_v35 = vsel %vm438_vm8, %v782_v28, 24  ;;  %vm563_vm8 = vcmask 31744  }
 0x4ae   : > { %v444_v36 = vsel %vm288_vm1, %v441_v35, 2147483647  ;;  %v461_v37 = vshra.s32 %v459_v34, 16  ;;  %v460_v46 = vand.u32 65535, %v459_v34 }
 0x4af   : > { %v437_v38 = vpop.xlane.xlu0 %436  ;;  %v446_v39 = vshra.s32 %v444_v36, 16  ;;  %v445_v47 = vand.u32 65535, %v444_v36 }
 0x4b0   : > { %vm440_vm9 = vcmp.le.f32.partialorder %v879_v29, %v437_v38  ;;  %v463_v40 = vcvt.s32.f32 %v461_v37  ;;  %v462_v49 = vcvt.s32.f32 %v460_v46 }
 0x4b1   : > { %v443_v41 = vsel %vm440_vm9, %v782_v28, 24  ;;  %v448_v42 = vcvt.s32.f32 %v446_v39  ;;  %v447_v51 = vcvt.s32.f32 %v445_v47 }
 0x4b2   : > { %v474_v43 = vsel %vm288_vm1, %v443_v41, 2147483647  ;;  %464 = vmin.xlane.f32.xlu0 %v463_v40 }
 0x4b3   : > { %449 = vmin.xlane.f32.xlu1 %v448_v42  ;;  %v476_v44 = vshra.s32 %v474_v43, 16  ;;  %v475_v52 = vand.u32 65535, %v474_v43 }
 0x4b5   : > { %v478_v45 = vcvt.s32.f32 %v476_v44  ;;  %v477_v56 = vcvt.s32.f32 %v475_v52 }
 0x4b7   : > { %479 = vmin.xlane.f32.xlu1 %v478_v45 }
 0x53f   : > { %v465_v48 = vpop.xlane.xlu0 %464 }
 0x540   : > { %v450_v50 = vpop.xlane.xlu1 %449  ;;  %vm466_vm10 = vcmp.eq.f32.partialorder %v463_v40, %v465_v48  ;;  %v471_v58 = vcvt.f32.s32 %v465_v48 }
 0x541   : > { %vm451_vm11 = vcmp.eq.f32.partialorder %v448_v42, %v450_v50  ;;  %v467_v53 = vsel %vm466_vm10, %v462_v49, inf  ;;  %v456_v59 = vcvt.f32.s32 %v450_v50 }
 0x542   : > { %v452_v54 = vsel %vm451_vm11, %v447_v51, inf  ;;  %468 = vmin.xlane.f32.xlu1 %v467_v53  ;;  %v472_v61 = vshll.u32 %v471_v58, 16 }
 0x543   : > { %453 = vmin.xlane.f32.xlu0 %v452_v54  ;;  %v457_v1 = vshll.u32 %v456_v59, 16 }
 0x544   : > { %v480_v55 = vpop.xlane.xlu1 %479 }
 0x545   : > { %vm481_vm12 = vcmp.eq.f32.partialorder %v478_v45, %v480_v55  ;;  %v486_v62 = vcvt.f32.s32 %v480_v55 }
 0x546   : > { %v482_v57 = vsel %vm481_vm12, %v477_v56, inf }
 0x547   : > { %483 = vmin.xlane.f32.xlu0 %v482_v57  ;;  %v487_v5 = vshll.u32 %v486_v62, 16 }
 0x5cf   : > { %v469_v60 = vpop.xlane.xlu1 %468 }
 0x5d0   : > { %v470_v63 = vcvt.f32.s32 %v469_v60  ;;  %v454_v0 = vpop.xlane.xlu0 %453 }
 0x5d1   : > { %v455_v2 = vcvt.f32.s32 %v454_v0 }
 0x5d2   : > { %v473_v3 = vadd.s32 %v472_v61, %v470_v63 }
 0x5d3   : > { %v458_v4 = vadd.s32 %v457_v1, %v455_v2 }
 0x5d4   : > { %v896_v6 = vsel %vm489_vm13, %v473_v3, %v852_v17  ;;  %v484_v7 = vpop.xlane.xlu0 %483  ;;  %vm494_vm14 = vcmp.eq.s32.totalorder %v782_v28, %v473_v3 }
 0x5d5   : > { %v902_v8 = vsel %vm489_vm13, %v458_v4, %v857_v19  ;;  %v485_v9 = vcvt.f32.s32 %v484_v7  ;;  %v497_v10 = vsel %vm494_vm14, inf, %v861_v21  ;;  %vm493_vm15 = vcmp.eq.s32.totalorder %v782_v28, %v458_v4 }
 0x5d6   : > { %v502_v11 = vsel %vm288_vm1, %v497_v10, inf  ;;  %v496_v12 = vsel %vm493_vm15, inf, %v864_v22 }
 0x5d7   : > { %v488_v13 = vadd.s32 %v487_v5, %v485_v9  ;;  %503 = vmin.xlane.f32.xlu0 %v502_v11  ;;  %v499_v14 = vsel %vm288_vm1, %v496_v12, inf }
 0x5d8   : > { %500 = vmin.xlane.f32.xlu1 %v499_v14 }
 0x5d9   : > { %v912_v15 = vsel %vm489_vm13, %v488_v13, %v875_v27  ;;  %vm495_vm0 = vcmp.eq.s32.totalorder %v782_v28, %v488_v13 }
 0x5da   : > { %v498_v16 = vsel %vm495_vm0, inf, %v879_v29 }
 0x5db   : > { %v505_v17 = vsel %vm288_vm1, %v498_v16, inf }
 0x5dc   : > { %506 = vmin.xlane.f32.xlu1 %v505_v17 }
 0x664   : > { %v504_v18 = vpop.xlane.xlu0 %503 }
 0x665   : > { %v501_v19 = vpop.xlane.xlu1 %500  ;;  %vm509_vm2 = vcmp.le.f32.partialorder %v497_v10, %v504_v18 }
 0x666   : > { %vm508_vm3 = vcmp.le.f32.partialorder %v496_v12, %v501_v19  ;;  %v512_v20 = vsel %vm509_vm2, %v782_v28, 24 }
 0x667   : > { %v511_v21 = vsel %vm508_vm3, %v782_v28, 24  ;;  %v529_v22 = vsel %vm288_vm1, %v512_v20, 2147483647 }
 0x668   : > { %v514_v23 = vsel %vm288_vm1, %v511_v21, 2147483647  ;;  %v531_v24 = vshra.s32 %v529_v22, 16  ;;  %v530_v34 = vand.u32 65535, %v529_v22 }
 0x669   : > { %v507_v25 = vpop.xlane.xlu1 %506  ;;  %v516_v26 = vshra.s32 %v514_v23, 16  ;;  %v515_v35 = vand.u32 65535, %v514_v23 }
 0x66a   : > { %vm510_vm4 = vcmp.le.f32.partialorder %v498_v16, %v507_v25  ;;  %v533_v27 = vcvt.s32.f32 %v531_v24  ;;  %v532_v37 = vcvt.s32.f32 %v530_v34 }
 0x66b   : > { %v513_v29 = vsel %vm510_vm4, %v782_v28, 24  ;;  %v518_v30 = vcvt.s32.f32 %v516_v26  ;;  %v517_v39 = vcvt.s32.f32 %v515_v35 }
 0x66c   : > { %v544_v31 = vsel %vm288_vm1, %v513_v29, 2147483647  ;;  %534 = vmin.xlane.f32.xlu1 %v533_v27 }
 0x66d   : > { %519 = vmin.xlane.f32.xlu0 %v518_v30  ;;  %v546_v32 = vshra.s32 %v544_v31, 16  ;;  %v545_v40 = vand.u32 65535, %v544_v31 }
 0x66f   : > { %v548_v33 = vcvt.s32.f32 %v546_v32  ;;  %v547_v44 = vcvt.s32.f32 %v545_v40 }
 0x671   : > { %549 = vmin.xlane.f32.xlu0 %v548_v33 }
 0x6f9   : > { %v535_v36 = vpop.xlane.xlu1 %534 }
 0x6fa   : > { %v520_v38 = vpop.xlane.xlu0 %519  ;;  %vm536_vm5 = vcmp.eq.f32.partialorder %v533_v27, %v535_v36  ;;  %v541_v46 = vcvt.f32.s32 %v535_v36 }
 0x6fb   : > { %v537_v41 = vsel %vm536_vm5, %v532_v37, inf  ;;  %vm521_vm6 = vcmp.eq.f32.partialorder %v518_v30, %v520_v38  ;;  %v526_v47 = vcvt.f32.s32 %v520_v38 }
 0x6fc   : > { %538 = vmin.xlane.f32.xlu0 %v537_v41  ;;  %v522_v42 = vsel %vm521_vm6, %v517_v39, inf  ;;  %v542_v49 = vshll.u32 %v541_v46, 16 }
 0x6fd   : > { %523 = vmin.xlane.f32.xlu1 %v522_v42  ;;  %v527_v52 = vshll.u32 %v526_v47, 16 }
 0x6fe   : > { %v550_v43 = vpop.xlane.xlu0 %549 }
 0x6ff   : > { %vm551_vm1 = vcmp.eq.f32.partialorder %v548_v33, %v550_v43  ;;  %v556_v53 = vcvt.f32.s32 %v550_v43 }
 0x700   : > { %v552_v45 = vsel %vm551_vm1, %v547_v44, inf }
 0x701   : > { %553 = vmin.xlane.f32.xlu1 %v552_v45  ;;  %v557_v59 = vshll.u32 %v556_v53, 16 }
 0x789   : > { %v539_v48 = vpop.xlane.xlu0 %538 }
 0x78a   : > { %v524_v50 = vpop.xlane.xlu1 %523  ;;  %v540_v51 = vcvt.f32.s32 %v539_v48 }
 0x78b   : > { %v525_v54 = vcvt.f32.s32 %v524_v50 }
 0x78c   : > { %v543_v55 = vadd.s32 %v542_v49, %v540_v51 }
 0x78d   : > { %v528_v56 = vadd.s32 %v527_v52, %v525_v54 }
 0x78e   : > { %v561_v57 = vsel %vm559_vm7, %v543_v55, %v896_v6  ;;  %v554_v58 = vpop.xlane.xlu1 %553 }
 0x78f   : > { %v560_v60 = vsel %vm559_vm7, %v528_v56, %v902_v8  ;;  %565 = vst.msk [vmem:[%s198_s23 + $0x8] sm:$0xff] %vm563_vm8, %v561_v57  ;;  %v555_v61 = vcvt.f32.s32 %v554_v58 }
 0x790   : > { %564 = vst.msk [vmem:[%s198_s23] sm:$0xff] %vm563_vm8, %v560_v60 }
 0x791   : > { %v558_v62 = vadd.s32 %v557_v59, %v555_v61 }
 0x793   : > { %v562_v28 = vsel %vm559_vm7, %v558_v62, %v912_v15 }
 0x794   : > { %566 = vst.msk [vmem:[%s198_s23 + $0x10] sm:$0xff] %vm563_vm8, %v562_v28 }
 0x795 PF: > { %s12_s11 = sadd.s32 1, %s732_s11   ;;  %s944_s9 = smov %s728_s10 }
 0x796   : > { %p9_p5 = scmp.ge.s32.totalorder %s12_s11, 4   ;;  %s945_s10 = smov %s947_s12 }
 0x798   :  { %11 = sbr.rel (!%p9_p5) target bundleno = 2 (0x2), region = 61 }

// kernel: model_forward.4
= control target key start
LH: loop header
LB: loop body
LE: loop exit
PB: predicated region body
PF: predicated region fallthrough
CT: control target
= control target key end

     0   :  { %s1198_s21 = smov 0   ;;  %s1200_s22 = smov 0   ;;  %s1287_s0 = inlined_call_operand.vmem [shape: bf16[2,24,3], index: 0, kind: input, shape index: {}]   ;;  %s1288_s1 = inlined_call_operand.vmem [shape: s32[2,24,4], index: 1, kind: input, shape index: {}]   ;;  %s1289_s2 = inlined_call_operand.vmem [shape: bf16[3,32], index: 2, kind: input, shape index: {}]   ;;  %s1290_s3 = inlined_call_operand.vmem [shape: bf16[3,32], index: 3, kind: input, shape index: {}]   ;;  %s1291_s4 = inlined_call_operand.vmem [shape: f32[1,32], index: 4, kind: input, shape index: {}]   ;;  %s1292_s5 = inlined_call_operand.vmem [shape: f32[1,32], index: 5, kind: input, shape index: {}]   ;;  %s1293_s6 = inlined_call_operand.vmem [shape: bf16[2,24,32], index: 6, kind: output, shape index: {}]  }
   0x1   :  { %s1202_s23 = smov 0  }
   0x2 LB: > { %s28_s24 = sadd.s32 1, %s1151_s22  ;;  %p967_p0 = scmp.ge.s32.totalorder %s1155_s23, 1  ;;  %s1155_s23 = sphi %s1202_s23, %s16_s23   ;;  %s1151_s22 = sphi %s1200_s22, %s1295_s22   ;;  %s1147_s21 = sphi %s1198_s21, %s1294_s21  }
   0x3   : > { %p30_p1 = scmp.ge.s32.totalorder %s28_s24, 2  ;;  %p243_p2 = scmp.lt.s32.totalorder %s1155_s23, 3 }
   0x5   : > { %s1297_s24 = smov (%p30_p1, %s28_s24), 0  ;;  %p244_p3 = pnand %p967_p0, %p243_p2 }
   0x6   : > { %v319_v0 = vld [vmem:[%s1289_s2] sm:$0x3] (!%p244_p3)  ;;  %vm335_vm0 = vcmask (!%p244_p3), 1040384   ;;  %vm336_vm1 = vcmask (!%p244_p3), 1041408   ;;  %p286_p4 = scmp.lt.s32.totalorder (!%p244_p3), %s1147_s21, 1  ;;  %v1157_v1 = vmov (!%p244_p3), 65535   ;;  %v489_v18 = vlaneseq (!%p244_p3) }
   0x7   : > { %247 = sbr.rel (%p244_p3) target bundleno = 492 (0x1ec), region = 44  ;;  %v337_v2 = vsel (!%p244_p3), %vm335_vm0, 4294967295, %v1157_v1  ;;  %v1158_v4 = vmov (!%p244_p3), 0   ;;  %vm328_vm2 = vcmask (!%p244_p3), 23552   ;;  %v1159_v11 = vmov (!%p244_p3), 1  }
   0x8   : > { %v338_v3 = vsel (!%p244_p3), %vm336_vm1, %v337_v2, 0  ;;  %1120 = vset.pattern.permute.xlu1 (!%p244_p3), %v1158_v4  ;;  %1119 = vset.pattern.permute.xlu0 (!%p244_p3), %v1158_v4  ;;  %v1160_v12 = vmov (!%p244_p3), 2   ;;  %v1161_v13 = vmov (!%p244_p3), 3   ;;  %v415_v14 = vld [vmem:[%s1290_s3] sm:$0x3] (!%p244_p3)  ;;  %v490_v19 = vand.u32 (!%p244_p3), 127, %v489_v18 }
   0x9   : > { %v340_v5 = vand.u32 (!%p244_p3), %v338_v3, %v319_v0  ;;  %v436_v15 = vand.u32 (!%p244_p3), %v415_v14, %v338_v3  ;;  %v1162_v22 = vmov (!%p244_p3), 0.0   ;;  %vm523_vm7 = vcmask (!%p244_p3), 195584  }
   0xa   : > { %vm403_vm0 = vcmask (!%p244_p3), 257024   ;;  %vm530_vm1 = vcmask (!%p244_p3), 1043456  }
   0xb   : > { %1039 = vmatprep.subr.bf16.mxu0 (!%p244_p3), %v340_v5  ;;  %1045 = vmatprep.subr.bf16.mxu1 (!%p244_p3), %v436_v15 }
   0xc   : > { %1040 = vmatpush3.bf16.msra.mxu0 (!%p244_p3), %v340_v5  ;;  %1046 = vmatpush3.bf16.msra.mxu1 (!%p244_p3), %v436_v15 }
   0xe   : > { %s1299_s21 = smov (!%p286_p4, %s1147_s21), 1 }
   0xf   : > { %s1087_s27 = smul.u32 12, %s1299_s21 }
  0x10   : > { %s1088_s28 = smul.u32 24, %s1299_s21 }
  0x11   : > { %s1228_s7 = scalar_lea.vmem %s1287_s0, %s1087_s27  ;;  %s309_s19 = scalar_lea.vmem %s1293_s6, %s1087_s27 }
  0x12   : > { %v1127_v6 = vld [vmem:[%s1228_s7] sm:$0xff]   ;;  %s299_s10 = scalar_lea.vmem %s1288_s1, %s1088_s28  ;;  %v1128_v7 = vld [vmem:[%s1228_s7 + $0x8] ss:$0 sps:$4 sm:$0xff]  }
  0x13   : > { %v488_v8 = vld [vmem:[%s299_s10 + $0x10] sm:$0xff]  ;;  %1041 = vmatprep.mubr.msk.bf16.mxu0 %vm328_vm2, %v1127_v6  ;;  %v486_v9 = vld [vmem:[%s299_s10] sm:$0xff]  ;;  %v487_v10 = vld [vmem:[%s299_s10 + $0x8] sm:$0xff] }
  0x14   : > { %501 = vperm.xlu1 %1120, %v488_v8   ;;  %1042 = vmatmul.mubr.msk.bf16.vlgmr.msra.gmra.mrb[0].mxu0 %vm328_vm2, %v1128_v7  ;;  %v1129_v16 = vld [vmem:[%s1228_s7] sm:$0xff]   ;;  %v1130_v17 = vld [vmem:[%s1228_s7 + $0x8] ss:$0 sps:$4 sm:$0xff]  }
  0x15   : > { %495 = vperm.xlu0 %1119, %v486_v9   ;;  %1047 = vmatprep.mubr.msk.bf16.mxu1 %vm328_vm2, %v1129_v16 }
  0x16   : > { %1048 = vmatmul.mubr.msk.bf16.vlgmr.msra.gmra.mrb[0].mxu1 %vm328_vm2, %v1130_v17 }
  0x18   : > { %1121 = vset.pattern.permute.xlu1 %v1159_v11 }
  0x19   : > { %498 = vperm.xlu0 %1119, %v487_v10   ;;  %583 = vperm.xlu1 %1121, %v486_v9  }
  0x1d   : > { %1122 = vset.pattern.permute.xlu0 %v1159_v11  ;;  %589 = vperm.xlu1 %1121, %v488_v8  }
  0x1e   : > { %586 = vperm.xlu0 %1122, %v487_v10  }
  0x21   : > { %1123 = vset.pattern.permute.xlu1 %v1160_v12 }
  0x22   : > { %660 = vperm.xlu1 %1123, %v486_v9   ;;  %1124 = vset.pattern.permute.xlu0 %v1160_v12 }
  0x23   : > { %663 = vperm.xlu0 %1124, %v487_v10  }
  0x26   : > { %666 = vperm.xlu1 %1123, %v488_v8  }
  0x27   : > { %1126 = vset.pattern.permute.xlu0 %v1161_v13 }
  0x28   : > { %740 = vperm.xlu0 %1126, %v487_v10  }
  0x2a   : > { %1125 = vset.pattern.permute.xlu1 %v1161_v13 }
  0x2b   : > { %737 = vperm.xlu1 %1125, %v486_v9  }
  0x2f   : > { %743 = vperm.xlu1 %1125, %v488_v8  }
  0x93   : > { %v502_v20 = vpop.permute.xlu1 %501 }
  0x94   : > { %vm505_vm3 = vcmp.eq.s32.totalorder %v490_v19, %v502_v20  ;;  %v496_v21 = vpop.permute.xlu0 %495 }
  0x95   : > { %v1244_v23 = vsel %vm505_vm3, 1.0, %v1162_v22  ;;  %vm503_vm4 = vcmp.eq.s32.totalorder %v490_v19, %v496_v21 }
  0x96   : > { %v982_v24 = vsel %vm503_vm4, 1.0, %v1162_v22  ;;  %v513_v59 = vpack.c.bf16 %v1244_v23, %v1244_v23 }
  0x98   : > { %v584_v25 = vpop.permute.xlu1 %583  ;;  %v499_v26 = vpop.permute.xlu0 %498 }
  0x99   : > { %vm504_vm5 = vcmp.eq.s32.totalorder %v490_v19, %v499_v26  ;;  %vm591_vm6 = vcmp.eq.s32.totalorder %v490_v19, %v584_v25 }
  0x9a   : > { %v983_v27 = vsel %vm504_vm5, 1.0, %v1162_v22  ;;  %v989_v30 = vsel %vm591_vm6, 1.0, %v1162_v22 }
  0x9b   : > { %v512_v28 = vpack.c.bf16 %v983_v27, %v982_v24  ;;  %v1004_v24 = vld [vmem:[%s1291_s4] ss:$0 sm:$0xff] }
  0x9c   : > { %v590_v29 = vpop.permute.xlu1 %589 }
  0x9d   : > { %vm593_vm8 = vcmp.eq.s32.totalorder %v490_v19, %v590_v29  ;;  %v587_v31 = vpop.permute.xlu0 %586  ;;  %1055 = vmatprep.mubr.msk.bf16.mxu0 %vm523_vm7, %v512_v28  ;;  %v1005_v29 = vld [vmem:[%s1292_s5] ss:$0 sm:$0xff] }
  0x9e   : > { %v991_v32 = vsel %vm593_vm8, 1.0, %v1162_v22  ;;  %vm592_vm9 = vcmp.eq.s32.totalorder %v490_v19, %v587_v31 }
  0x9f   : > { %v990_v33 = vsel %vm592_vm9, 1.0, %v1162_v22  ;;  %v601_v60 = vpack.c.bf16 %v991_v32, %v991_v32 }
  0xa0   : > { %v600_v34 = vpack.c.bf16 %v990_v33, %v989_v30 }
  0xa1   : > { %v661_v35 = vpop.permute.xlu1 %660 }
  0xa2   : > { %vm668_vm10 = vcmp.eq.s32.totalorder %v490_v19, %v661_v35  ;;  %1063 = vmatprep.mubr.msk.bf16.mxu1 %vm523_vm7, %v600_v34  ;;  %v664_v36 = vpop.permute.xlu0 %663 }
  0xa3   : > { %v994_v37 = vsel %vm668_vm10, 1.0, %v1162_v22  ;;  %vm669_vm11 = vcmp.eq.s32.totalorder %v490_v19, %v664_v36 }
  0xa4   : > { %v995_v38 = vsel %vm669_vm11, 1.0, %v1162_v22 }
  0xa5   : > { %v667_v39 = vpop.permute.xlu1 %666  ;;  %v677_v40 = vpack.c.bf16 %v995_v38, %v994_v37 }
  0xa6   : > { %vm670_vm12 = vcmp.eq.s32.totalorder %v490_v19, %v667_v39 }
  0xa7   : > { %v996_v41 = vsel %vm670_vm12, 1.0, %v1162_v22  ;;  %v741_v42 = vpop.permute.xlu0 %740 }
  0xa8   : > { %vm746_vm13 = vcmp.eq.s32.totalorder %v490_v19, %v741_v42  ;;  %v678_v61 = vpack.c.bf16 %v996_v41, %v996_v41 }
  0xa9   : > { %v1000_v43 = vsel %vm746_vm13, 1.0, %v1162_v22 }
  0xaa   : > { %v738_v44 = vpop.permute.xlu1 %737 }
  0xab   : > { %vm745_vm14 = vcmp.eq.s32.totalorder %v490_v19, %v738_v44 }
  0xac   : > { %v999_v45 = vsel %vm745_vm14, 1.0, %v1162_v22 }
  0xad   : > { %v754_v46 = vpack.c.bf16 %v1000_v43, %v999_v45 }
  0xae   : > { %v744_v47 = vpop.permute.xlu1 %743 }
  0xaf   : > { %vm747_vm15 = vcmp.eq.s32.totalorder %v490_v19, %v744_v47 }
  0xb0   : > { %v1001_v48 = vsel %vm747_vm15, 1.0, %v1162_v22 }
  0xb1   : > { %v755_v62 = vpack.c.bf16 %v1001_v48, %v1001_v48 }
  0xe7   : > { %v1043_v49 = vpop.f32.mrb[0].mxu0 }
  0xe8   : > { %v1013_v50 = vpack.c.bf16 %v1043_v49, %v1043_v49  ;;  %v376_v51 = vpop.f32.mrb[1].mxu0 }
  0xe9   : > { %v1011_v52 = vpack.c.bf16 %v376_v51, %v376_v51  ;;  %v1044_v53 = vpop.f32.mrb[2].mxu0  ;;  %v1049_v63 = vpop.f32.mrb[0].mxu1 }
  0xea   : > { %406 = vst.msk [vmem:[#allocation2 + $0x8] sm:$0xf] %vm403_vm0, %v1013_v50  ;;  %v379_v54 = vpop.f32.mrb[3].mxu0  ;;  %v472_v0 = vpop.f32.mrb[1].mxu1 }
  0xeb   : > { %404 = vst.msk [vmem:[#allocation2] sm:$0xf] %vm403_vm0, %v1011_v52  ;;  %v1012_v55 = vpack.c.bf16 %v379_v54, %v379_v54  ;;  %v1050_v1 = vpop.f32.mrb[2].mxu1 }
  0xec   : > { %v475_v2 = vpop.f32.mrb[3].mxu1 }
  0xed   : > { %405 = vst.msk [vmem:[#allocation2 + $0x4] sm:$0xf] %vm403_vm0, %v1012_v55 }
  0xf1   : > { %v1132_v57 = vld [vmem:[#allocation2 + $0x8] ss:$0 sps:$4 sm:$0xff]  }
  0xf2   : > { %v532_v58 = vsel %vm530_vm1, %v1132_v57, 0 }
  0xf4   : > { %v1131_v56 = vld [vmem:[#allocation2] sm:$0xff]  }
  0xf5   : > { %1051 = vmatprep.subr.bf16.mxu0 %v1131_v56  ;;  %1059 = vmatprep.subr.bf16.mxu1 %v1131_v56 }
  0xf6   : > { %1052 = vmatpush3.bf16.msra.mxu0 %v1131_v56  ;;  %1060 = vmatpush3.bf16.msra.mxu1 %v1131_v56 }
  0xf7   : > { %1083 = vmatprep.subr.msk.bf16.mxu0 %vm530_vm1, %v1132_v57  ;;  %1084 = vmatprep.subr.msk.bf16.mxu1 %vm530_vm1, %v1132_v57 }
  0xfa   : > { %1054 = vmatpush3.bf16.msra.mxu0 %v532_v58  ;;  %1062 = vmatpush3.bf16.msra.mxu1 %v532_v58 }
  0xfb   : > { %1067 = vmatprep.subr.bf16.mxu0 %v1131_v56  ;;  %1075 = vmatprep.subr.bf16.mxu1 %v1131_v56 }
  0xfd   : > { %1056 = vmatmul.mubr.msk.bf16.vlgmr.msra.gmra.mrb[4].mxu0 %vm523_vm7, %v513_v59  ;;  %1064 = vmatmul.mubr.msk.bf16.vlgmr.msra.gmra.mrb[4].mxu1 %vm523_vm7, %v601_v60 }
  0xfe   : > { %1068 = vmatpush3.bf16.msra.mxu0 %v1131_v56  ;;  %1071 = vmatprep.mubr.msk.bf16.mxu0 %vm523_vm7, %v677_v40 }
  0xff   : > { %1076 = vmatpush3.bf16.msra.mxu1 %v1131_v56  ;;  %1085 = vmatprep.subr.msk.bf16.mxu0 %vm530_vm1, %v1132_v57 }
 0x100   : > { %1086 = vmatprep.subr.msk.bf16.mxu1 %vm530_vm1, %v1132_v57  ;;  %1079 = vmatprep.mubr.msk.bf16.mxu1 %vm523_vm7, %v754_v46 }
 0x102   : > { %1070 = vmatpush3.bf16.msra.mxu0 %v532_v58 }
 0x103   : > { %1078 = vmatpush3.bf16.msra.mxu1 %v532_v58 }
 0x105   : > { %1072 = vmatmul.mubr.msk.bf16.vlgmr.msra.gmra.mrb[8].mxu0 %vm523_vm7, %v678_v61 }
 0x106   : > { %1080 = vmatmul.mubr.msk.bf16.vlgmr.msra.gmra.mrb[8].mxu1 %vm523_vm7, %v755_v62 }
 0x1d0   : > { %v1057_v3 = vpop.f32.mrb[4].mxu0  ;;  %v1065_v4 = vpop.f32.mrb[4].mxu1 }
 0x1d1   : > { %v658_v5 = vmax.f32 %v1057_v3, %v1065_v4  ;;  %v568_v6 = vpop.f32.mrb[5].mxu0  ;;  %v642_v7 = vpop.f32.mrb[5].mxu1 }
 0x1d2   : > { %v656_v8 = vmax.f32 %v568_v6, %v642_v7  ;;  %v1058_v9 = vpop.f32.mrb[6].mxu0  ;;  %v1066_v10 = vpop.f32.mrb[6].mxu1 }
 0x1d3   : > { %v571_v11 = vpop.f32.mrb[7].mxu0  ;;  %v645_v12 = vpop.f32.mrb[7].mxu1 }
 0x1d4   : > { %v657_v13 = vmax.f32 %v571_v11, %v645_v12 }
 0x1d8   : > { %v1073_v14 = vpop.f32.mrb[8].mxu0 }
 0x1d9   : > { %v735_v15 = vmax.f32 %v658_v5, %v1073_v14  ;;  %v1081_v16 = vpop.f32.mrb[8].mxu1  ;;  %v719_v17 = vpop.f32.mrb[9].mxu0 }
 0x1da   : > { %v733_v18 = vmax.f32 %v656_v8, %v719_v17  ;;  %v796_v19 = vpop.f32.mrb[9].mxu1  ;;  %v1074_v20 = vpop.f32.mrb[10].mxu0 }
 0x1db   : > { %v812_v21 = vmax.f32 %v735_v15, %v1081_v16  ;;  %v1082_v22 = vpop.f32.mrb[10].mxu1  ;;  %v722_v23 = vpop.f32.mrb[11].mxu0 }
 0x1dc   : > { %v810_v25 = vmax.f32 %v733_v18, %v796_v19  ;;  %v734_v26 = vmax.f32 %v657_v13, %v722_v23  ;;  %v799_v27 = vpop.f32.mrb[11].mxu1 }
 0x1dd   : > { %v815_v28 = vadd.f32 %v1049_v63, %v812_v21 }
 0x1de   : > { %v813_v30 = vadd.f32 %v810_v25, %v472_v0  ;;  %v811_v31 = vmax.f32 %v734_v26, %v799_v27 }
 0x1df   : > { %v825_v32 = vmul.f32 %v1004_v24, %v815_v28 }
 0x1e0   : > { %v823_v33 = vmul.f32 %v1004_v24, %v813_v30  ;;  %v814_v34 = vadd.f32 %v811_v31, %v475_v2 }
 0x1e1   : > { %v835_v35 = vadd.f32 %v1005_v29, %v825_v32 }
 0x1e2   : > { %v833_v36 = vadd.f32 %v1005_v29, %v823_v33  ;;  %v824_v37 = vmul.f32 %v1004_v24, %v814_v34 }
 0x1e3   : > { %vm838_vm2 = vcmp.ge.f32.partialorder %v835_v35, 0.0  ;;  %v841_v38 = vmul.f32 0.2, %v835_v35 }
 0x1e4   : > { %vm836_vm3 = vcmp.ge.f32.partialorder %v833_v36, 0.0  ;;  %v839_v39 = vmul.f32 0.2, %v833_v36  ;;  %v834_v40 = vadd.f32 %v1005_v29, %v824_v37 }
 0x1e5   : > { %v844_v41 = vsel %vm838_vm2, %v835_v35, %v841_v38 }
 0x1e6   : > { %v1016_v42 = vpack.c.bf16 %v844_v41, %v844_v41  ;;  %v842_v43 = vsel %vm836_vm3, %v833_v36, %v839_v39  ;;  %vm837_vm4 = vcmp.ge.f32.partialorder %v834_v40, 0.0  ;;  %v840_v44 = vmul.f32 0.2, %v834_v40 }
 0x1e7   : > { %v1014_v45 = vpack.c.bf16 %v842_v43, %v842_v43 }
 0x1e8   : > { %861 = vst.msk [vmem:[%s309_s19 + $0x8] sm:$0xf] %vm403_vm0, %v1016_v42  ;;  %v843_v46 = vsel %vm837_vm4, %v834_v40, %v840_v44 }
 0x1e9   : > { %859 = vst.msk [vmem:[%s309_s19] sm:$0xf] %vm403_vm0, %v1014_v45  ;;  %v1015_v47 = vpack.c.bf16 %v843_v46, %v843_v46 }
 0x1eb   : > { %860 = vst.msk [vmem:[%s309_s19 + $0x4] sm:$0xf] %vm403_vm0, %v1015_v47 }
 0x1ec PF: > { %s16_s23 = sadd.s32 1, %s1155_s23   ;;  %s1294_s21 = smov %s1151_s22 }
 0x1ed   : > { %p13_p5 = scmp.ge.s32.totalorder %s16_s23, 4   ;;  %s1295_s22 = smov %s1297_s24 }
 0x1ef   :  { %15 = sbr.rel (!%p13_p5) target bundleno = 2 (0x2), region = 82 }

// kernel: model_forward.5
= control target key start
LH: loop header
LB: loop body
LE: loop exit
PB: predicated region body
PF: predicated region fallthrough
CT: control target
= control target key end

     0   :  { %s2142_s0 = inlined_call_operand.vmem [shape: bf16[2,24,32], index: 0, kind: input, shape index: {}]   ;;  %s2143_s1 = inlined_call_operand.vmem [shape: s32[2,24,4], index: 1, kind: input, shape index: {}]   ;;  %s2144_s2 = inlined_call_operand.vmem [shape: bf16[32,32], index: 2, kind: input, shape index: {}]   ;;  %s2145_s3 = inlined_call_operand.vmem [shape: bf16[32,32], index: 3, kind: input, shape index: {}]   ;;  %s2146_s4 = inlined_call_operand.vmem [shape: f32[1,32], index: 4, kind: input, shape index: {}]   ;;  %s2147_s5 = inlined_call_operand.vmem [shape: f32[1,32], index: 5, kind: input, shape index: {}]   ;;  %s2148_s6 = inlined_call_operand.vmem [shape: f32[32,64], index: 6, kind: input, shape index: {}]   ;;  %s2149_s7 = inlined_call_operand.vmem [shape: f32[32,64], index: 7, kind: input, shape index: {}]   ;;  %s2150_s8 = inlined_call_operand.vmem [shape: f32[1,64], index: 8, kind: input, shape index: {}]   ;;  %s2151_s9 = inlined_call_operand.vmem [shape: f32[1,64], index: 9, kind: input, shape index: {}]   ;;  %s2152_s10 = inlined_call_operand.vmem [shape: f32[64,10], index: 10, kind: input, shape index: {}]   ;;  %s2153_s11 = inlined_call_operand.vmem [shape: f32[1,10], index: 11, kind: input, shape index: {}]   ;;  %s2154_s12 = inlined_call_operand.hbm [shape: f32[2,1,10], index: 12, kind: output, shape index: {}]  }
   0x1   :  { %2156 = sst [smem:[#allocation9_spill]] %s2142_s0 }
   0x2   :  { %2157 = sst [smem:[#allocation10_spill]] %s2143_s1 }
   0x3   :  { %17 = vsyncpa [#allocation6], 0 }
   0x4   :  { %19 = vsyncpa [#allocation6 + $0x1], 0  ;;  %s1863_s21 = smov 0   ;;  %s1865_s22 = smov 0  }
   0x5   :  { %s1867_s23 = smov 0   ;;  %s1869_s24 = smov 0  }
   0x6   :  { %s1871_s25 = smov 0   ;;  %s1873_s26 = smov 0  }
   0x7 LB: > { %s1409_s27 = sadd.s32 4294967295, %s1787_s26   ;;  %s1410_s28 = sadd.s32 4294967294, %s1787_s26   ;;  %s1787_s26 = sphi %s1873_s26, %s25_s26   ;;  %s1783_s25 = sphi %s1871_s25, %s2168_s25   ;;  %s1779_s24 = sphi %s1869_s24, %s2167_s24   ;;  %s1775_s23 = sphi %s1867_s23, %s2166_s23   ;;  %s1771_s22 = sphi %s1865_s22, %s2165_s22   ;;  %s1767_s21 = sphi %s1863_s21, %s2164_s21  }
   0x8   : > { %s37_s29 = sadd.s32 1, %s1783_s25  ;;  %s308_s30 = sadd.s32 1, %s1775_s23 }
   0x9   : > { %p39_p0 = scmp.ge.s32.totalorder %s37_s29, 2  ;;  %p318_p1 = scmp.ne.s32.totalorder %s1775_s23, %s1771_s22 }
   0xa   : > { %p319_p2 = scmp.eq.s32.totalorder %s1409_s27, 1  ;;  %p324_p3 = scmp.ne.s32.totalorder %s1771_s22, %s1767_s21 }
   0xb   : > { %s2170_s29 = smov (%p39_p0, %s37_s29), 0  ;;  %p325_p5 = scmp.eq.s32.totalorder %s1410_s28, 1 }
   0xc   : > { %2158 = sst [smem:[#allocation8_spill]] %s2170_s29  ;;  %p1903_p4 = por %p319_p2, %p318_p1 }
   0xd   : > { %s305_s14 = ssub.s32 %s1783_s25, %s2170_s29  ;;  %p1413_p6 = scmp.ge.s32.totalorder %s1787_s26, 1 }
   0xe   : > { %p306_p7 = scmp.eq.s32.totalorder %s305_s14, 0  ;;  %p1910_p8 = por %p325_p5, %p324_p3 }
   0xf   : > { %p394_p9 = scmp.lt.s32.totalorder %s1787_s26, 3 }
  0x10   : > { %s1916_s16 = scalar_select %p306_p7, %s1775_s23, %s308_s30  }
  0x11   : > { %p395_p10 = pnand %p1413_p6, %p394_p9 }
  0x12   : > { %v1699_v0 = vld [vmem:[%s2144_s2] sm:$0xff] (!%p395_p10)   ;;  %p444_p11 = scmp.lt.s32.totalorder (!%p395_p10), %s1779_s24, 1  ;;  %v1700_v1 = vld [vmem:[%s2144_s2 + $0x8] sm:$0xff] (!%p395_p10)   ;;  %v1789_v2 = vmov (!%p395_p10), 0   ;;  %s2161_s0 = sld [smem:[#allocation9_spill]] (!%p395_p10)  ;;  %vm491_vm0 = vcmask (!%p395_p10), 261120   ;;  %v656_v15 = vlaneseq (!%p395_p10) }
  0x13   : > { %398 = sbr.rel (%p395_p10) target bundleno = 983 (0x3d7), region = 68  ;;  %1507 = vmatprep.subr.bf16.mxu0 (!%p395_p10), %v1699_v0  ;;  %1692 = vset.pattern.permute.xlu1 (!%p395_p10), %v1789_v2  ;;  %s2162_s1 = sld [smem:[#allocation10_spill]] (!%p395_p10)  ;;  %v1790_v8 = vmov (!%p395_p10), 1   ;;  %v1791_v9 = vmov (!%p395_p10), 2   ;;  %v1792_v10 = vmov (!%p395_p10), 3   ;;  %v1703_v11 = vld [vmem:[%s2145_s3] sm:$0xff] (!%p395_p10)  }
  0x14   : > { %1508 = vmatpush3.bf16.msra.mxu0 (!%p395_p10), %v1699_v0  ;;  %1691 = vset.pattern.permute.xlu0 (!%p395_p10), %v1789_v2  ;;  %v1704_v12 = vld [vmem:[%s2145_s3 + $0x8] sm:$0xff] (!%p395_p10)   ;;  %v1949_v16 = vand.u32 (!%p395_p10), 127, %v656_v15  ;;  %v1793_v19 = vmov (!%p395_p10), 0.0   ;;  %vm690_vm5 = vcmask (!%p395_p10), 195584   ;;  %vm559_vm7 = vcmask (!%p395_p10), 257024  }
  0x15   : > { %1509 = vmatprep.subr.bf16.mxu0 (!%p395_p10), %v1700_v1  ;;  %1515 = vmatprep.subr.bf16.mxu1 (!%p395_p10), %v1703_v11  ;;  %vm697_vm11 = vcmask (!%p395_p10), 1043456   ;;  %v1794_v0 = vmov (!%p395_p10), -inf   ;;  %v1075_v2 = vld [vmem:[%s2149_s7 + $0x8] sm:$0xff] (!%p395_p10) }
  0x16   : > { %1516 = vmatpush3.bf16.msra.mxu1 (!%p395_p10), %v1703_v11 }
  0x17   : > { %1517 = vmatprep.subr.bf16.mxu1 (!%p395_p10), %v1704_v12 }
  0x18   : > { %1510 = vmatpush3.bf16.msra.mxu0 (!%p395_p10), %v1700_v1  ;;  %v1074_v1 = vld [vmem:[%s2149_s7] sm:$0xff] (!%p395_p10) }
  0x1a   : > { %s445_s27 = scalar_select %p444_p11, %s1779_s24, 1  ;;  %1518 = vmatpush3.bf16.msra.mxu1 %v1704_v12  ;;  %v1231_v12 = vld [vmem:[%s2152_s10 + $0x18] sm:$0xff] }
  0x1c   : > { %s1626_s28 = smul.u32 12, %s445_s27 }
  0x1d   : > { %s1627_s30 = smul.u32 24, %s445_s27 }
  0x1e   : > { %s1929_s17 = scalar_lea.vmem %s2161_s0, %s1626_s28  ;;  %s1458_s28 = sshll.u32 %s1779_s24, 4 }
  0x1f   : > { %v1701_v3 = vld [vmem:[%s1929_s17] sm:$0xff]   ;;  %s457_s20 = scalar_lea.vmem %s2162_s1, %s1627_s30  ;;  %v1702_v4 = vld [vmem:[%s1929_s17 + $0x8] ss:$0 sps:$4 sm:$0xff]   ;;  %s2095_s19 = scalar_lea.hbm %s2154_s12, %s1458_s28 }
  0x20   : > { %v655_v5 = vld [vmem:[%s457_s20 + $0x10] sm:$0xff]  ;;  %1511 = vmatprep.mubr.msk.bf16.mxu0 %vm491_vm0, %v1701_v3  ;;  %v653_v6 = vld [vmem:[%s457_s20] sm:$0xff]  ;;  %v654_v7 = vld [vmem:[%s457_s20 + $0x8] sm:$0xff]  ;;  %s442_s20 = sand.u32 1, %s1771_s22   ;;  %s1797_s24 = smov [#allocation5]  }
  0x21   : > { %668 = vperm.xlu1 %1692, %v655_v5   ;;  %1512 = vmatmul.mubr.msk.bf16.vlgmr.msra.gmra.mrb[0].mxu0 %vm491_vm0, %v1702_v4  ;;  %v1705_v13 = vld [vmem:[%s1929_s17] sm:$0xff]   ;;  %v1706_v14 = vld [vmem:[%s1929_s17 + $0x8] ss:$0 sps:$4 sm:$0xff]   ;;  %v1076_v3 = vld [vmem:[%s2149_s7 + $0x10] sm:$0xff]  ;;  %v1795_v4 = vmov 0.0|0.0   ;;  %s443_s30 = scalar_lea.vmem [#allocation5], %s442_s20 }
  0x22   : > { %662 = vperm.xlu0 %1691, %v653_v6   ;;  %1519 = vmatprep.mubr.msk.bf16.mxu1 %vm491_vm0, %v1705_v13  ;;  %s1326_s14 = sshll.u32 %s443_s30, 4  ;;  %s1314_s29 = scalar_lea.sflag [#allocation6], %s442_s20  ;;  %s2097_s14 = int_to_ptr.vmem [resolvable:$true] %s1326_s14 }
  0x23   : > { %1520 = vmatmul.mubr.msk.bf16.vlgmr.msra.gmra.mrb[0].mxu1 %vm491_vm0, %v1706_v14  ;;  %v1232_v14 = vld [vmem:[%s2152_s10 + $0x20] sm:$0xff]  ;;  %s1709_s27 = scalar_lea.vmem %s2097_s14, 16  ;;  %s1713_s0 = sshll.u32 %s1797_s24, 4  ;;  %s1714_s0 = int_to_ptr.vmem [resolvable:$false] %s1713_s0 }
  0x24   : > { %p1710_p12 = scmp.ne.s32.totalorder %s2097_s14, %s1709_s27  ;;  %s1715_s1 = scalar_lea.vmem %s1714_s0, 32 }
  0x25   : > { %1693 = vset.pattern.permute.xlu1 %v1790_v8  ;;  %p1716_p1 = scmp.lt.s32.totalorder %s2097_s14, %s1714_s0  ;;  %p1717_p2 = scmp.lt.s32.totalorder %s1715_s1, %s1709_s27 }
  0x26   : > { %665 = vperm.xlu0 %1691, %v654_v7   ;;  %750 = vperm.xlu1 %1693, %v653_v6   ;;  %p1711_p13 = pnand %p1710_p12, %p1903_p4 }
  0x27   : > { %p1718_p3 = por %p1717_p2, %p1716_p1 }
  0x28   : > { %p1712_p0 = pneg %p1711_p13 }
  0x2a   : > { %1694 = vset.pattern.permute.xlu0 %v1790_v8  ;;  %756 = vperm.xlu1 %1693, %v655_v5   ;;  %v1228_v8 = vld [vmem:[%s2152_s10] sm:$0xff]  ;;  %p1719_p5 = pnand %p1718_p3, %p1712_p0 }
  0x2b   : > { %753 = vperm.xlu0 %1694, %v654_v7  }
  0x2e   : > { %1695 = vset.pattern.permute.xlu1 %v1791_v9 }
  0x2f   : > { %827 = vperm.xlu1 %1695, %v653_v6   ;;  %1696 = vset.pattern.permute.xlu0 %v1791_v9  ;;  %v1229_v9 = vld [vmem:[%s2152_s10 + $0x8] sm:$0xff] }
  0x30   : > { %830 = vperm.xlu0 %1696, %v654_v7   ;;  %v1609_v11 = vpack.c.bf16 %v1229_v9, %v1228_v8 }
  0x33   : > { %833 = vperm.xlu1 %1695, %v655_v5  }
  0x34   : > { %1698 = vset.pattern.permute.xlu0 %v1792_v10 }
  0x35   : > { %907 = vperm.xlu0 %1698, %v654_v7  }
  0x37   : > { %1697 = vset.pattern.permute.xlu1 %v1792_v10  ;;  %v1230_v10 = vld [vmem:[%s2152_s10 + $0x10] sm:$0xff] }
  0x38   : > { %904 = vperm.xlu1 %1697, %v653_v6   ;;  %v1077_v6 = vld [vmem:[%s2149_s7 + $0x18] sm:$0xff]  ;;  %v1612_v13 = vpack.c.bf16 %v1231_v12, %v1230_v10 }
  0x39   : > { %v1600_v7 = vpack.c.bf16 %v1077_v6, %v1076_v3 }
  0x3c   : > { %910 = vperm.xlu1 %1697, %v655_v5   ;;  %v1597_v5 = vpack.c.bf16 %v1075_v2, %v1074_v1 }
  0xa0   : > { %v669_v17 = vpop.permute.xlu1 %668 }
  0xa1   : > { %vm672_vm1 = vcmp.eq.s32.totalorder %v1949_v16, %v669_v17  ;;  %v663_v18 = vpop.permute.xlu0 %662 }
  0xa2   : > { %vm670_vm2 = vcmp.eq.s32.totalorder %v1949_v16, %v663_v18  ;;  %v1433_v44 = vsel %vm672_vm1, 1.0, %v1793_v19  ;;  %vm563_vm1 = vcmask 253952  }
  0xa3   : > { %v1431_v20 = vsel %vm670_vm2, 1.0, %v1793_v19  ;;  %v680_v51 = vpack.c.bf16 %v1433_v44, %v1433_v44  ;;  %564 = vst.msk [vmem:[#allocation3] sm:$0x1] %vm563_vm1, %v1794_v0  ;;  %565 = vst.msk [vmem:[#allocation4] sm:$0x1] %vm563_vm1, %v1793_v19  ;;  %vm1796_vm2 = vmmov 0  }
  0xa5   : > { %v666_v21 = vpop.permute.xlu0 %665  ;;  %v751_v22 = vpop.permute.xlu1 %750 }
  0xa6   : > { %vm671_vm3 = vcmp.eq.s32.totalorder %v1949_v16, %v666_v21  ;;  %vm758_vm4 = vcmp.eq.s32.totalorder %v1949_v16, %v751_v22 }
  0xa7   : > { %v1432_v23 = vsel %vm671_vm3, 1.0, %v1793_v19  ;;  %v1438_v25 = vsel %vm758_vm4, 1.0, %v1793_v19 }
  0xa8   : > { %v679_v24 = vpack.c.bf16 %v1432_v23, %v1431_v20 }
  0xa9   : > { %v757_v29 = vpop.permute.xlu1 %756 }
  0xaa   : > { %v754_v26 = vpop.permute.xlu0 %753  ;;  %1527 = vmatprep.mubr.msk.bf16.mxu0 %vm690_vm5, %v679_v24  ;;  %vm760_vm8 = vcmp.eq.s32.totalorder %v1949_v16, %v757_v29 }
  0xab   : > { %vm759_vm6 = vcmp.eq.s32.totalorder %v1949_v16, %v754_v26  ;;  %v1440_v45 = vsel %vm760_vm8, 1.0, %v1793_v19 }
  0xac   : > { %v1439_v27 = vsel %vm759_vm6, 1.0, %v1793_v19  ;;  %v768_v52 = vpack.c.bf16 %v1440_v45, %v1440_v45  ;;  %v1454_v45 = vld [vmem:[%s2147_s5] ss:$0 sm:$0xff] }
  0xad   : > { %v767_v28 = vpack.c.bf16 %v1439_v27, %v1438_v25 }
  0xae   : > { %v828_v36 = vpop.permute.xlu1 %827 }
  0xaf   : > { %1535 = vmatprep.mubr.msk.bf16.mxu1 %vm690_vm5, %v767_v28  ;;  %v831_v39 = vpop.permute.xlu0 %830  ;;  %vm835_vm9 = vcmp.eq.s32.totalorder %v1949_v16, %v828_v36 }
  0xb0   : > { %vm836_vm10 = vcmp.eq.s32.totalorder %v1949_v16, %v831_v39  ;;  %v1443_v46 = vsel %vm835_vm9, 1.0, %v1793_v19 }
  0xb1   : > { %v1444_v47 = vsel %vm836_vm10, 1.0, %v1793_v19 }
  0xb2   : > { %v834_v38 = vpop.permute.xlu1 %833  ;;  %v844_v54 = vpack.c.bf16 %v1444_v47, %v1443_v46 }
  0xb3   : > { %vm837_vm14 = vcmp.eq.s32.totalorder %v1949_v16, %v834_v38 }
  0xb4   : > { %v908_v41 = vpop.permute.xlu0 %907  ;;  %v1445_v56 = vsel %vm837_vm14, 1.0, %v1793_v19 }
  0xb5   : > { %vm913_vm13 = vcmp.eq.s32.totalorder %v1949_v16, %v908_v41  ;;  %v845_v58 = vpack.c.bf16 %v1445_v56, %v1445_v56 }
  0xb6   : > { %v1449_v50 = vsel %vm913_vm13, 1.0, %v1793_v19 }
  0xb7   : > { %v905_v43 = vpop.permute.xlu1 %904 }
  0xb8   : > { %vm912_vm12 = vcmp.eq.s32.totalorder %v1949_v16, %v905_v43 }
  0xb9   : > { %v1448_v49 = vsel %vm912_vm12, 1.0, %v1793_v19 }
  0xba   : > { %v921_v55 = vpack.c.bf16 %v1449_v50, %v1448_v49  ;;  %v1013_v49 = vshrl.u32 %v656_v15, 7 }
  0xbb   : > { %v911_v53 = vpop.permute.xlu1 %910 }
  0xbc   : > { %vm914_vm15 = vcmp.eq.s32.totalorder %v1949_v16, %v911_v53  ;;  %v1233_v16 = vld [vmem:[%s2152_s10 + $0x28] sm:$0xff]  ;;  %v1015_v56 = vadd.s32 16, %v1013_v49 }
  0xbd   : > { %v1450_v57 = vsel %vm914_vm15, 1.0, %v1793_v19  ;;  %v1615_v17 = vpack.c.bf16 %v1233_v16, %v1232_v14 }
  0xbe   : > { %v922_v59 = vpack.c.bf16 %v1450_v57, %v1450_v57 }
  0xf4   : > { %v1513_v30 = vpop.f32.mrb[0].mxu0 }
  0xf5   : > { %v1463_v31 = vpack.c.bf16 %v1513_v30, %v1513_v30  ;;  %v532_v32 = vpop.f32.mrb[1].mxu0 }
  0xf6   : > { %v1461_v33 = vpack.c.bf16 %v532_v32, %v532_v32  ;;  %v1514_v34 = vpop.f32.mrb[2].mxu0  ;;  %v1990_v60 = vpop.f32.mrb[0].mxu1 }
  0xf7   : > { %562 = vst.msk [vmem:[#allocation2 + $0x8] sm:$0xf] %vm559_vm7, %v1463_v31  ;;  %v535_v35 = vpop.f32.mrb[3].mxu0  ;;  %v1992_v61 = vpop.f32.mrb[1].mxu1 }
  0xf8   : > { %560 = vst.msk [vmem:[#allocation2] sm:$0xf] %vm559_vm7, %v1461_v33  ;;  %v1462_v37 = vpack.c.bf16 %v535_v35, %v535_v35  ;;  %v1522_v62 = vpop.f32.mrb[2].mxu1 }
  0xf9   : > { %v1994_v63 = vpop.f32.mrb[3].mxu1 }
  0xfa   : > { %561 = vst.msk [vmem:[#allocation2 + $0x4] sm:$0xf] %vm559_vm7, %v1462_v37  ;;  %vm1311_vm7 = vcmask 73728  }
  0xfe   : > { %v1708_v42 = vld [vmem:[#allocation2 + $0x8] ss:$0 sps:$4 sm:$0xff]  }
  0xff   : > { %v699_v48 = vsel %vm697_vm11, %v1708_v42, 0 }
 0x101   : > { %v1707_v40 = vld [vmem:[#allocation2] sm:$0xff]  }
 0x102   : > { %1523 = vmatprep.subr.bf16.mxu0 %v1707_v40  ;;  %1531 = vmatprep.subr.bf16.mxu1 %v1707_v40 }
 0x103   : > { %1524 = vmatpush3.bf16.msra.mxu0 %v1707_v40  ;;  %1532 = vmatpush3.bf16.msra.mxu1 %v1707_v40 }
 0x104   : > { %1622 = vmatprep.subr.msk.bf16.mxu0 %vm697_vm11, %v1708_v42  ;;  %1623 = vmatprep.subr.msk.bf16.mxu1 %vm697_vm11, %v1708_v42 }
 0x107   : > { %1526 = vmatpush3.bf16.msra.mxu0 %v699_v48  ;;  %1534 = vmatpush3.bf16.msra.mxu1 %v699_v48 }
 0x108   : > { %1539 = vmatprep.subr.bf16.mxu0 %v1707_v40  ;;  %1547 = vmatprep.subr.bf16.mxu1 %v1707_v40 }
 0x10a   : > { %1528 = vmatmul.mubr.msk.bf16.vlgmr.msra.gmra.mrb[4].mxu0 %vm690_vm5, %v680_v51  ;;  %1536 = vmatmul.mubr.msk.bf16.vlgmr.msra.gmra.mrb[4].mxu1 %vm690_vm5, %v768_v52 }
 0x10b   : > { %1540 = vmatpush3.bf16.msra.mxu0 %v1707_v40  ;;  %1543 = vmatprep.mubr.msk.bf16.mxu0 %vm690_vm5, %v844_v54 }
 0x10c   : > { %1548 = vmatpush3.bf16.msra.mxu1 %v1707_v40  ;;  %1624 = vmatprep.subr.msk.bf16.mxu0 %vm697_vm11, %v1708_v42  ;;  %v1453_v40 = vld [vmem:[%s2146_s4] ss:$0 sm:$0xff] }
 0x10d   : > { %1625 = vmatprep.subr.msk.bf16.mxu1 %vm697_vm11, %v1708_v42  ;;  %1551 = vmatprep.mubr.msk.bf16.mxu1 %vm690_vm5, %v921_v55 }
 0x10f   : > { %1542 = vmatpush3.bf16.msra.mxu0 %v699_v48 }
 0x110   : > { %1550 = vmatpush3.bf16.msra.mxu1 %v699_v48  ;;  %1596 = vmatprep.subr.bf16.mxu0 %v1795_v4 }
 0x111   : > { %1608 = vmatprep.subr.bf16.mxu1 %v1795_v4 }
 0x112   : > { %1544 = vmatmul.mubr.msk.bf16.vlgmr.msra.gmra.mrb[8].mxu0 %vm690_vm5, %v845_v58 }
 0x113   : > { %1552 = vmatmul.mubr.msk.bf16.vlgmr.msra.gmra.mrb[8].mxu1 %vm690_vm5, %v922_v59  ;;  %1563 = vmatprep.mubr.msk.f32.mxu0 %vm1796_vm2, %v1793_v19  ;;  %vm1022_vm5 = vcmp.lt.s32.totalorder %v1015_v56, 20 }
 0x114   : > { %1593 = vmatprep.mubr.msk.f32.mxu1 %vm1796_vm2, %v1793_v19  ;;  %1598 = vmatpush3.bf16.msra.mxu0 %v1597_v5 }
 0x115   : > { %1599 = vmatprep.subr.bf16.mxu0 %v1795_v4  ;;  %1610 = vmatpush3.bf16.msra.mxu1 %v1609_v11 }
 0x116   : > { %1611 = vmatprep.subr.bf16.mxu1 %v1795_v4 }
 0x118   : > { %1601 = vmatpush3.bf16.msra.mxu0 %v1600_v7 }
 0x119   : > { %1602 = vmatprep.subr.bf16.mxu0 %v1795_v4  ;;  %1613 = vmatpush3.bf16.msra.mxu1 %v1612_v13 }
 0x11a   : > { %1614 = vmatprep.subr.bf16.mxu1 %v1795_v4 }
 0x11d   : > { %1616 = vmatpush3.bf16.msra.mxu1 %v1615_v17 }
 0x11e   : > { %1617 = vmatprep.subr.bf16.mxu1 %v1795_v4 }
 0x1dd   : > { %v1529_v18 = vpop.f32.mrb[4].mxu0  ;;  %v1537_v20 = vpop.f32.mrb[4].mxu1 }
 0x1de   : > { %v825_v21 = vmax.f32 %v1529_v18, %v1537_v20  ;;  %v735_v22 = vpop.f32.mrb[5].mxu0  ;;  %v809_v23 = vpop.f32.mrb[5].mxu1 }
 0x1df   : > { %v823_v24 = vmax.f32 %v735_v22, %v809_v23  ;;  %v1530_v25 = vpop.f32.mrb[6].mxu0  ;;  %v1538_v26 = vpop.f32.mrb[6].mxu1  ;;  %v1035_v23 = vld [vmem:[#allocation3] sm:$0x1] }
 0x1e0   : > { %v738_v27 = vpop.f32.mrb[7].mxu0  ;;  %v812_v28 = vpop.f32.mrb[7].mxu1 }
 0x1e1   : > { %v824_v29 = vmax.f32 %v738_v27, %v812_v28 }
 0x1e5   : > { %v1545_v30 = vpop.f32.mrb[8].mxu0 }
 0x1e6   : > { %v902_v31 = vmax.f32 %v825_v21, %v1545_v30  ;;  %v1553_v32 = vpop.f32.mrb[8].mxu1  ;;  %v886_v33 = vpop.f32.mrb[9].mxu0  ;;  %v1071_v30 = vld [vmem:[%s2148_s6 + $0x8] sm:$0xff] }
 0x1e7   : > { %v900_v34 = vmax.f32 %v823_v24, %v886_v33  ;;  %v963_v35 = vpop.f32.mrb[9].mxu1  ;;  %v1546_v36 = vpop.f32.mrb[10].mxu0  ;;  %v1050_v24 = vld [vmem:[#allocation4] sm:$0x1] }
 0x1e8   : > { %v979_v37 = vmax.f32 %v902_v31, %v1553_v32  ;;  %v1554_v38 = vpop.f32.mrb[10].mxu1  ;;  %v889_v39 = vpop.f32.mrb[11].mxu0 }
 0x1e9   : > { %v977_v41 = vmax.f32 %v900_v34, %v963_v35  ;;  %v901_v42 = vmax.f32 %v824_v29, %v889_v39  ;;  %v966_v43 = vpop.f32.mrb[11].mxu1  ;;  %v1070_v29 = vld [vmem:[%s2148_s6] sm:$0xff]  ;;  %v1072_v34 = vld [vmem:[%s2148_s6 + $0x10] sm:$0xff]  ;;  %v1073_v35 = vld [vmem:[%s2148_s6 + $0x18] sm:$0xff] }
 0x1ea   : > { %v982_v44 = vadd.f32 %v1990_v60, %v979_v37  ;;  %v1603_v32 = vpack.c.bf16 %v1071_v30, %v1070_v29  ;;  %v1606_v36 = vpack.c.bf16 %v1073_v35, %v1072_v34  ;;  %v1234_v38 = vld [vmem:[%s2152_s10 + $0x30] sm:$0xff]  ;;  %v1235_v39 = vld [vmem:[%s2152_s10 + $0x38] sm:$0xff] }
 0x1eb   : > { %v980_v46 = vadd.f32 %v977_v41, %v1992_v61  ;;  %v978_v47 = vmax.f32 %v901_v42, %v966_v43  ;;  %v1226_v41 = vld [vmem:[%s2151_s9] sm:$0x1] }
 0x1ec   : > { %v992_v48 = vmul.f32 %v1453_v40, %v982_v44 }
 0x1ed   : > { %v990_v50 = vmul.f32 %v1453_v40, %v980_v46  ;;  %v981_v51 = vadd.f32 %v978_v47, %v1994_v63 }
 0x1ee   : > { %v1002_v52 = vadd.f32 %v1454_v45, %v992_v48 }
 0x1ef   : > { %v1000_v53 = vadd.f32 %v1454_v45, %v990_v50  ;;  %v991_v54 = vmul.f32 %v1453_v40, %v981_v51  ;;  %v1618_v40 = vpack.c.bf16 %v1235_v39, %v1234_v38 }
 0x1f0   : > { %v1008_v55 = vmul.f32 0.2, %v1002_v52  ;;  %vm1005_vm3 = vcmp.ge.f32.partialorder %v1002_v52, 0.0 }
 0x1f1   : > { %v1006_v57 = vmul.f32 0.2, %v1000_v53  ;;  %v1001_v58 = vadd.f32 %v1454_v45, %v991_v54  ;;  %vm1003_vm4 = vcmp.ge.f32.partialorder %v1000_v53, 0.0  ;;  %1619 = vmatpush3.bf16.msra.mxu1 %v1618_v40  ;;  %v1236_v45 = vld [vmem:[%s2153_s11] sm:$0x1] }
 0x1f2   : > { %v1011_v59 = vsel %vm1005_vm3, %v1002_v52, %v1008_v55 }
 0x1f3   : > { %vm1004_vm6 = vcmp.ge.f32.partialorder %v1001_v58, 0.0  ;;  %v1009_v60 = vsel %vm1003_vm4, %v1000_v53, %v1006_v57  ;;  %v1007_v61 = vmul.f32 0.2, %v1001_v58  ;;  %v1031_v62 = vsel %vm1022_vm5, %v1011_v59, -inf }
 0x1f4   : > { %v1034_v0 = vsel %vm1022_vm5, %v1011_v59, 0.0  ;;  %v1036_v1 = vsel %vm491_vm0, %v1009_v60, -inf  ;;  %v1051_v63 = vsel %vm491_vm0, %v1009_v60, 0.0  ;;  %v1038_v7 = vsel %vm491_vm0, %v1031_v62, -inf }
 0x1f5   : > { %v1010_v15 = vsel %vm1004_vm6, %v1001_v58, %v1007_v61  ;;  %v1054_v8 = vsel %vm491_vm0, %v1034_v0, 0.0 }
 0x1f6   : > { %v1037_v2 = vsel %vm491_vm0, %v1010_v15, -inf  ;;  %v1052_v3 = vsel %vm491_vm0, %v1010_v15, 0.0 }
 0x1f7   : > { %v1039_v5 = vmax.f32 %v1036_v1, %v1037_v2  ;;  %v1053_v6 = vadd.f32 %v1052_v3, %v1051_v63 }
 0x1f9   : > { %v1040_v9 = vmax.f32 %v1039_v5, %v1038_v7  ;;  %v1055_v10 = vadd.f32 %v1054_v8, %v1053_v6 }
 0x1fb   : > { %v1041_v11 = vrot.slane %v1040_v9, 4  ;;  %v1056_v12 = vrot.slane %v1055_v10, 4 }
 0x1fd   : > { %v1042_v13 = vmax.f32 %v1040_v9, %v1041_v11  ;;  %v1057_v14 = vadd.f32 %v1056_v12, %v1055_v10 }
 0x1ff   : > { %v1043_v16 = vrot.slane %v1042_v13, 2  ;;  %v1058_v17 = vrot.slane %v1057_v14, 2 }
 0x201   : > { %v1044_v18 = vmax.f32 %v1042_v13, %v1043_v16  ;;  %v1059_v20 = vadd.f32 %v1058_v17, %v1057_v14 }
 0x203   : > { %v1045_v21 = vrot.slane %v1044_v18, 1  ;;  %v1060_v22 = vrot.slane %v1059_v20, 1 }
 0x205   : > { %v1046_v25 = vmax.f32 %v1044_v18, %v1045_v21  ;;  %v1061_v26 = vadd.f32 %v1060_v22, %v1059_v20 }
 0x207   : > { %v1047_v27 = vmax.f32 %v1035_v23, %v1046_v25  ;;  %v1062_v28 = vadd.f32 %v1061_v26, %v1050_v24 }
 0x209   : > { %1049 = vst.msk [vmem:[#allocation3] sm:$0x1] %vm563_vm1, %v1047_v27  ;;  %1063 = vst.msk [vmem:[#allocation4] sm:$0x1] %vm563_vm1, %v1062_v28 }
 0x210   : > { %v1068_v31 = vld [vmem:[#allocation4] sm:$0x1]  ;;  %v1067_v37 = vld [vmem:[#allocation3] sm:$0x1] }
 0x211   : > { %v1069_v33 = vmul.f32 0.05, %v1068_v31 }
 0x213   : > { %1564 = vmatmul.mubr.msk.f32.vlgmr.msra.gmra.mrb[12].mxu0 %vm491_vm0, %v1069_v33 }
 0x214   : > { %1604 = vmatpush3.bf16.msra.mxu0 %v1603_v32  ;;  %1574 = vmatprep.mubr.msk.f32.mxu0 %vm1796_vm2, %v1793_v19  ;;  %v1224_v19 = vld [vmem:[%s2150_s8] sm:$0x1] }
 0x215   : > { %1605 = vmatprep.subr.bf16.mxu0 %v1795_v4 }
 0x218   : > { %1607 = vmatpush3.bf16.msra.mxu0 %v1606_v36 }
 0x21b   : > { %1575 = vmatmul.mubr.msk.f32.vlgmr.msra.gmra.mrb[12].mxu0 %vm491_vm0, %v1067_v37  ;;  %vm1237_vm0 = vcmask 523264  }
 0x2ee   : > { %v1220_v4 = vpop.f32.mrb[12].mxu0 }
 0x2ef   : > { %v1225_v42 = vmul.f32 %v1224_v19, %v1220_v4  ;;  %v1576_v43 = vpop.f32.mrb[13].mxu0 }
 0x2f1   : > { %v1227_v44 = vadd.f32 %v1226_v41, %v1225_v42 }
 0x2f3   : > { %1594 = vmatmul.mubr.msk.f32.vlgmr.msra.gmra.mrb[12].mxu1 %vm1237_vm0, %v1227_v44 }
 0x3c6   : > { %v1307_v46 = vpop.f32.mrb[12].mxu1 }
 0x3c7   : > { %v1308_v47 = vadd.f32 %v1307_v46, %v1236_v45  ;;  %v1595_v48 = vpop.f32.mrb[13].mxu1 }
 0x3c9   : > { %1312 = vst.msk [vmem:[%s443_s30] sm:$0x1] %vm1311_vm7, %v1308_v47 }
 0x3ca   : > { %1722 = shalt.err (!%p1719_p5)
}
 0x3cb   : > { %s1723_s20 = scalar_lea.hbm %s2095_s19, 16  ;;  %s1727_s17 = scalar_lea.hbm %s2154_s12, 32 }
 0x3cc   : > { %p1724_p6 = scmp.ne.s32.totalorder %s2095_s19, %s1723_s20  ;;  %p1728_p10 = scmp.lt.u32.totalorder %s2095_s19, %s2154_s12 }
 0x3cd   : > { %p1729_p11 = scmp.lt.u32.totalorder %s1727_s17, %s1723_s20  ;;  %p1731_p13 = scmp.lt.u32.totalorder %s1723_s20, %s2095_s19 }
 0x3ce   : > { %p1725_p7 = pnand %p1724_p6, %p1903_p4 }
 0x3cf   : > { %p1730_p12 = por %p1729_p11, %p1728_p10 }
 0x3d0   : > { %p1726_p9 = pneg %p1725_p7 }
 0x3d1   : > { %p1732_p0 = por %p1731_p13, %p1730_p12 }
 0x3d3   : > { %p1733_p1 = pnand %p1732_p0, %p1726_p9 }
 0x3d5   : > { %1736 = shalt.err (!%p1733_p1)
}
 0x3d6   : > { %1628 = dma.vmem_to_hbm [thread:$0]  (%p1903_p4), %s2097_s14, 16, %s2095_s19, %s1314_s29  }
 0x3d7 PF: > { %p1634_p2 = scmp.ge.s32.totalorder %s1787_s26, 2  ;;  %s1338_s1 = sand.u32 1, %s1767_s21  }
 0x3d8   : > { %s1339_s27 = scalar_lea.sflag [#allocation6], %s1338_s1 }
 0x3d9   : > { %p1631_p3 = pnand %p1634_p2, %p1910_p8 }
 0x3db   : > { %1762 = dma.done.wait (!%p1631_p3), %s1339_s27, 16  }
 0x3dc   : > { %1764 = vsyncadd (!%p1631_p3), %s1339_s27, 4294967280  ;;  %s25_s26 = sadd.s32 1, %s1787_s26   ;;  %s2163_s13 = sld [smem:[#allocation8_spill]] }
 0x3dd   : > { %p22_p5 = scmp.ge.s32.totalorder %s25_s26, 4   ;;  %s2164_s21 = smov %s1771_s22 }
 0x3de   : > { %s2165_s22 = smov %s1775_s23  ;;  %s2166_s23 = smov %s1916_s16 }
 0x3df   : > { %s2167_s24 = smov %s1783_s25  ;;  %24 = sbr.rel (!%p22_p5) target bundleno = 7 (0x7), region = 115 }
 0x3e2   : > { %s2168_s25 = smov %s2163_s13 }
 0x3e6   :  { %1343 = vsyncpa [#allocation6], 1 }
 0x3e7   :  { %1345 = vsyncpa [#allocation6 + $0x1], 1 }

</bundles_post_ra>
